<compile_context>
chip_gen: v7x
topology: tpu7x:2x2x1
jax: 0.10.0
libtpu: 0.0.40
codegen_flags: <defaults>
</compile_context>

<pallas_src>
import functools

import jax
import jax.numpy as jnp
from jax import lax
from jax.experimental import pallas as pl
from jax.experimental.pallas import tpu as pltpu

EPS = 1e-5          # BatchNorm2d default eps
NEG_SLOPE = 0.1     # LeakyReLU negative_slope


def _round_up(x, m):
    return ((x + m - 1) // m) * m


def _itemsize(dt):
    return 2 if dt in (jnp.bfloat16, jnp.float16) else 4


def _divisors(n):
    out, i = set(), 1
    while i * i <= n:
        if n % i == 0:
            out.add(i)
            out.add(n // i)
        i += 1
    return sorted(out)


def _default_vmem_limit():
    # ~48 MiB on v7x (64 MiB physical), ~96 MiB on v5e/v6e (128 MiB physical).
    try:
        phys = int(pltpu.get_tpu_info().vmem_capacity_bytes)
    except Exception:
        phys = 64 * 1024 * 1024
    return min((phys * 3) // 4, 100 * 1024 * 1024)


# --------------------------------------------------------------------------- #
# Phase 1: conv (im2col + one fat MXU contraction, or per-tap dots for small  #
# Cin) + per-tile BN partials (row-sum and centered second moment).           #
# --------------------------------------------------------------------------- #
def _conv_stats_kernel(x_ref, w_ref, conv_ref, stat_ref, *scratch, KH, KW, TH,
                       Wo, CIN_PAD, TCO, use_im2col):
    # x_ref:    (Hp, Wp, CIN_PAD)        whole padded image (resident per n)
    # w_ref:    (KH*KW*CIN_PAD, TCO)     im2col-ordered weight block
    # conv_ref: (TH*Wo, TCO)             conv output tile (bf16 by default)
    # stat_ref: (2, TCO)                 [row-sum, centered M2] for this tile
    M = TH * Wo
    r = pl.program_id(1)
    row0 = pl.multiple_of(r * TH, TH)

    if use_im2col:
        patch_ref, = scratch
        # Build the (TH, Wo, K) im2col patch only once per (n, r); the COUT
        # axis (innermost, "arbitrary") reuses it from persistent scratch.
        @pl.when(pl.program_id(2) == 0)
        def _():
            for kh in range(KH):
                for kw in range(KW):
                    t = kh * KW + kw
                    patch_ref[:, :, t * CIN_PAD:(t + 1) * CIN_PAD] = (
                        x_ref[pl.ds(row0 + kh, TH), kw:kw + Wo, :])
        patch = patch_ref[...].reshape(M, KH * KW * CIN_PAD)
        c = jnp.dot(patch, w_ref[...], preferred_element_type=jnp.float32)
    else:
        # Small-Cin (stem) path: lane-sparse masked im2col stores would be
        # VPU/vst bound, so accumulate KH*KW thin dots on lane-dense views.
        c = jnp.zeros((M, TCO), jnp.float32)
        for kh in range(KH):
            for kw in range(KW):
                t = kh * KW + kw
                win = x_ref[pl.ds(row0 + kh, TH), kw:kw + Wo, :]
                c = c + jnp.dot(win.reshape(M, CIN_PAD),
                                w_ref[t * CIN_PAD:(t + 1) * CIN_PAD, :],
                                preferred_element_type=jnp.float32)

    conv_ref[...] = c.astype(conv_ref.dtype)

    # Per-tile BN partials: sum and centered second moment (equal-count merge
    # in the bridge avoids E[x^2]-E[x]^2 cancellation over the full batch).
    s = jnp.sum(c, axis=0, keepdims=True)
    d = c - s * (1.0 / M)
    stat_ref[0:1, :] = s
    stat_ref[1:2, :] = jnp.sum(d * d, axis=0, keepdims=True)


# --------------------------------------------------------------------------- #
# Phase 2: normalize (precomputed scale/bias) + LeakyReLU over flattened rows #
# --------------------------------------------------------------------------- #
def _bn_lrelu_kernel(conv_ref, scale_ref, bias_ref, out_ref, *, Cout):
    y = conv_ref[...].astype(jnp.float32) * scale_ref[...] + bias_ref[...]
    y = jnp.where(y > 0, y, NEG_SLOPE * y)
    out_ref[...] = y[:, :Cout].astype(out_ref.dtype)   # final output unpadded


# --------------------------------------------------------------------------- #
# Tile sizing under a VMEM budget                                             #
# --------------------------------------------------------------------------- #
def _phase1_bytes(TH, Wo, K, TCO, Hp, Wp, CIN_PAD, msz, isz, use_im2col):
    M = TH * Wo
    b = 2 * Hp * Wp * CIN_PAD * msz       # resident image (double-buffered)
    b += 2 * K * TCO * msz                # weight block  (double-buffered)
    b += 2 * M * TCO * isz                # conv-out block (double-buffered)
    b += 3 * M * TCO * 4                  # f32 transients (c, d, margin)
    if use_im2col:
        b += M * K * msz                  # im2col scratch
        if Wo % 8:
            b += M * K * msz              # possible relayout copy of the patch
    return b


def _pick_th(Ho, Wo, K, TCO, Hp, Wp, CIN_PAD, msz, isz, use_im2col, budget,
             target_m=2048):
    best = 1
    for th in _divisors(Ho):
        if th * Wo > target_m and th > 1:
            continue
        if _phase1_bytes(th, Wo, K, TCO, Hp, Wp, CIN_PAD, msz, isz,
                         use_im2col) <= budget:
            best = max(best, th)
    return best


def _pick_phase2_rows(rows_total, COUT_PAD, Cout, isz, budget, target=4096):
    best = 0
    for tb in _divisors(rows_total):
        if tb > target:
            continue
        if tb % 8 and tb != rows_total:
            continue
        need = 2 * tb * COUT_PAD * isz + 2 * tb * Cout * 4 + 2 * tb * COUT_PAD * 4
        if need <= budget:
            best = max(best, tb)
    return best if best else rows_total


# --------------------------------------------------------------------------- #
# Wrapper                                                                     #
# --------------------------------------------------------------------------- #
def conv_block(x, w_oihw, gamma, beta, *, stride=1, padding=1,
               mxu_dtype=jnp.bfloat16, inter_dtype=None,
               in_layout="NCHW", out_layout="NCHW"):
    """ConvBlock forward: Conv2d(bias=False) -> BatchNorm2d(batch stats) -> LeakyReLU(0.1)."""
    # TODO(synk): stride != 1 not implemented (YOLOv1's stride-2 3x3 block needs a
    # strided-window variant of the row slicing).
    assert stride == 1, "only stride=1 supported"
    if inter_dtype is None:
        inter_dtype = jnp.bfloat16 if mxu_dtype == jnp.bfloat16 else jnp.float32

    if in_layout == "NCHW":
        x = jnp.transpose(x, (0, 2, 3, 1))          # NHWC (chain in NHWC to skip)
    N, H, W, Cin = x.shape
    Cout, _, KH, KW = w_oihw.shape
    Ho = H + 2 * padding - (KH - 1)
    Wo = W + 2 * padding - (KW - 1)
    Hp, Wp = H + 2 * padding, W + 2 * padding

    CIN_PAD = _round_up(Cin, 8)                     # compact input channels
    COUT_PAD = _round_up(Cout, 128)                 # lane-dense matmul N dim
    use_im2col = CIN_PAD >= 128                     # stem uses per-tap dots
    # <=256-wide COUT blocks feed the 256x256 MXUs and keep the resident weight
    # block small enough for v7x's 64 MiB VMEM on deep layers.
    if COUT_PAD <= 256:
        TCO = COUT_PAD
    elif COUT_PAD % 256 == 0:
        TCO = 256
    else:
        TCO = 128
    CO = COUT_PAD // TCO
    K = KH * KW * CIN_PAD

    msz, isz = _itemsize(mxu_dtype), _itemsize(inter_dtype)
    vmem_limit = _default_vmem_limit()
    TH = _pick_th(Ho, Wo, K, TCO, Hp, Wp, CIN_PAD, msz, isz, use_im2col,
                  budget=int(vmem_limit * 0.7))
    R = Ho // TH
    M = TH * Wo
    # TODO(synk): for tiny spatial maps (Wo=7/14) M stays small; flattening N into
    # the matmul row axis would fill the MXU better.

    # ---- layout prep (single pass; no halo gather / duplicated rows) ----
    xp = jnp.pad(x.astype(jnp.float32),
                 ((0, 0), (padding, padding), (padding, padding),
                  (0, CIN_PAD - Cin))).astype(mxu_dtype)
    w = jnp.transpose(w_oihw, (2, 3, 1, 0)).astype(jnp.float32)       # HWIO
    w = jnp.pad(w, ((0, 0), (0, 0), (0, CIN_PAD - Cin), (0, COUT_PAD - Cout)))
    w2d = w.reshape(K, COUT_PAD).astype(mxu_dtype)

    gamma_p = jnp.pad(gamma.astype(jnp.float32), (0, COUT_PAD - Cout))
    beta_p = jnp.pad(beta.astype(jnp.float32), (0, COUT_PAD - Cout))

    kern1 = functools.partial(_conv_stats_kernel, KH=KH, KW=KW, TH=TH, Wo=Wo,
                              CIN_PAD=CIN_PAD, TCO=TCO, use_im2col=use_im2col)
    scratch = [pltpu.VMEM((TH, Wo, K), mxu_dtype)] if use_im2col else []

    conv_out, stats = pl.pallas_call(
        kern1,
        grid=(N, R, CO),
        in_specs=[
            # Whole padded image per batch element; block index constant over
            # (r, co) so it is DMA'd once per n and sliced in-kernel.
            pl.BlockSpec((None, Hp, Wp, CIN_PAD), lambda n, r, c: (n, 0, 0, 0)),
            pl.BlockSpec((K, TCO), lambda n, r, c: (0, c)),
        ],
        out_specs=[
            pl.BlockSpec((None, None, M, TCO), lambda n, r, c: (n, r, 0, c)),
            pl.BlockSpec((None, None, 2, TCO), lambda n, r, c: (n, r, 0, c)),
        ],
        out_shape=[
            jax.ShapeDtypeStruct((N, R, M, COUT_PAD), inter_dtype),   # bf16 intermediate
            jax.ShapeDtypeStruct((N, R, 2, COUT_PAD), jnp.float32),
        ],
        scratch_shapes=scratch,
        compiler_params=pltpu.CompilerParams(
            dimension_semantics=("parallel", "parallel", "arbitrary"),
            vmem_limit_bytes=vmem_limit),
    )(xp, w2d)

    # ---- bridge: finalize train-mode BN stats (equal-count tile merge, f32) ----
    n_tiles = N * R
    sum_t = stats[:, :, 0, :]                                   # (N, R, COUT_PAD)
    m2_t = stats[:, :, 1, :]
    mean_t = sum_t / M
    mean = jnp.mean(mean_t, axis=(0, 1))
    m2 = jnp.sum(m2_t, axis=(0, 1)) + M * jnp.sum((mean_t - mean) ** 2, axis=(0, 1))
    var = jnp.maximum(m2 / (M * n_tiles), 0.0)                  # biased variance
    scale_v = gamma_p * lax.rsqrt(var + EPS)
    bias_v = beta_p - mean * scale_v
    scale = scale_v.reshape(1, COUT_PAD)
    bias = bias_v.reshape(1, COUT_PAD)

    # ---- phase 2: 1-D grid over flattened rows, large lane-dense blocks ----
    rows_total = N * Ho * Wo                                    # == N * R * M
    conv_flat = conv_out.reshape(rows_total, COUT_PAD)          # free collapse
    TB = _pick_phase2_rows(rows_total, COUT_PAD, Cout, isz,
                           budget=int(vmem_limit * 0.5))

    out_flat = pl.pallas_call(
        functools.partial(_bn_lrelu_kernel, Cout=Cout),
        grid=(rows_total // TB,),
        in_specs=[
            pl.BlockSpec((TB, COUT_PAD), lambda i: (i, 0)),
            pl.BlockSpec((1, COUT_PAD), lambda i: (0, 0)),
            pl.BlockSpec((1, COUT_PAD), lambda i: (0, 0)),
        ],
        out_specs=pl.BlockSpec((TB, Cout), lambda i: (i, 0)),
        out_shape=jax.ShapeDtypeStruct((rows_total, Cout), jnp.float32),
        compiler_params=pltpu.CompilerParams(
            dimension_semantics=("parallel",),
            vmem_limit_bytes=vmem_limit),
    )(conv_flat, scale, bias)

    out = out_flat.reshape(N, Ho, Wo, Cout)                     # free reshape
    if out_layout == "NHWC":
        return out
    # NCHW to match the PyTorch module; this transpose costs one extra HBM
    # pass -- chain ConvBlocks with in_layout/out_layout="NHWC" to skip it.
    return jnp.transpose(out, (0, 3, 1, 2))


# --------------------------------------------------------------------------- #
# Pure-JAX reference matching PyTorch ConvBlock.forward (train-mode BN)        #
# --------------------------------------------------------------------------- #
def _reference(x_nchw, w_oihw, gamma, beta, *, padding=1):
    conv = lax.conv_general_dilated(
        x_nchw.astype(jnp.float32), w_oihw.astype(jnp.float32),
        window_strides=(1, 1), padding=[(padding, padding), (padding, padding)],
        dimension_numbers=("NCHW", "OIHW", "NCHW"),
        precision=lax.Precision.HIGHEST)
    mean = jnp.mean(conv, axis=(0, 2, 3), keepdims=True)
    var = jnp.mean((conv - mean) ** 2, axis=(0, 2, 3), keepdims=True)
    y = (conv - mean) * lax.rsqrt(var + EPS)
    y = y * gamma.reshape(1, -1, 1, 1) + beta.reshape(1, -1, 1, 1)
    return jnp.where(y > 0, y, NEG_SLOPE * y)


if __name__ == "__main__":
    key = jax.random.PRNGKey(0)
    fwd = jax.jit(conv_block, static_argnames=(
        "stride", "padding", "mxu_dtype", "inter_dtype", "in_layout", "out_layout"))

    # ---------------- case 1: small-Cin (per-tap) path ----------------
    k_x, k_w, k_g, k_b, key = jax.random.split(key, 5)
    N, Cin, H, W, Cout, Ksz = 2, 4, 16, 16, 8, 3
    x = jax.random.normal(k_x, (N, Cin, H, W), dtype=jnp.float32)
    w = jax.random.normal(k_w, (Cout, Cin, Ksz, Ksz), dtype=jnp.float32) * 0.1
    gamma = 1.0 + 0.1 * jax.random.normal(k_g, (Cout,), dtype=jnp.float32)
    beta = 0.1 * jax.random.normal(k_b, (Cout,), dtype=jnp.float32)

    ref = _reference(x, w, gamma, beta, padding=1)

    out_f32 = jax.block_until_ready(
        fwd(x, w, gamma, beta, padding=1, mxu_dtype=jnp.float32))
    assert out_f32.shape == (N, Cout, H, W), out_f32.shape
    assert jnp.allclose(out_f32, ref, atol=1e-4, rtol=1e-4), \
        float(jnp.max(jnp.abs(out_f32 - ref)))

    out_nhwc = jax.block_until_ready(
        fwd(x, w, gamma, beta, padding=1, mxu_dtype=jnp.float32,
            out_layout="NHWC"))
    assert jnp.allclose(out_nhwc, jnp.transpose(ref, (0, 2, 3, 1)),
                        atol=1e-4, rtol=1e-4)

    # bf16 fast path (bf16 MXU operands + bf16 intermediate, f32 epilogue),
    # compared against the reference run on bf16-quantized inputs.
    xq = x.astype(jnp.bfloat16).astype(jnp.float32)
    wq = w.astype(jnp.bfloat16).astype(jnp.float32)
    ref_q = _reference(xq, wq, gamma, beta, padding=1)
    out_bf16 = jax.block_until_ready(
        fwd(x, w, gamma, beta, padding=1, mxu_dtype=jnp.bfloat16))
    assert out_bf16.shape == (N, Cout, H, W)
    assert jnp.allclose(out_bf16, ref_q, atol=3e-2, rtol=3e-2), \
        float(jnp.max(jnp.abs(out_bf16 - ref_q)))

    # ---------------- case 2: im2col (fat-contraction) path ----------------
    k_x, k_w, k_g, k_b, key = jax.random.split(key, 5)
    N2, Cin2, H2, W2, Cout2 = 1, 128, 8, 8, 32
    x2 = jax.random.normal(k_x, (N2, Cin2, H2, W2), dtype=jnp.float32)
    w2 = jax.random.normal(k_w, (Cout2, Cin2, Ksz, Ksz), dtype=jnp.float32) * 0.05
    gamma2 = 1.0 + 0.1 * jax.random.normal(k_g, (Cout2,), dtype=jnp.float32)
    beta2 = 0.1 * jax.random.normal(k_b, (Cout2,), dtype=jnp.float32)

    ref2 = _reference(x2, w2, gamma2, beta2, padding=1)
    out2_f32 = jax.block_until_ready(
        fwd(x2, w2, gamma2, beta2, padding=1, mxu_dtype=jnp.float32))
    assert out2_f32.shape == (N2, Cout2, H2, W2)
    assert jnp.allclose(out2_f32, ref2, atol=2e-3, rtol=2e-3), \
        float(jnp.max(jnp.abs(out2_f32 - ref2)))

    x2q = x2.astype(jnp.bfloat16).astype(jnp.float32)
    w2q = w2.astype(jnp.bfloat16).astype(jnp.float32)
    ref2_q = _reference(x2q, w2q, gamma2, beta2, padding=1)
    out2_bf16 = jax.block_until_ready(
        fwd(x2, w2, gamma2, beta2, padding=1, mxu_dtype=jnp.bfloat16))
    assert jnp.allclose(out2_bf16, ref2_q, atol=3e-2, rtol=3e-2), \
        float(jnp.max(jnp.abs(out2_bf16 - ref2_q)))

    print("KERNEL_OK")
</pallas_src>

<mosaic_0001>
module attributes {stable_mosaic.version = 11 : i64} {
  func.func @_conv_stats_kernel(%arg0: i32, %arg1: i32, %arg2: i32, %arg3: memref<1x18x18x8xf32, #tpu.memory_space<vmem>>, %arg4: memref<72x128xf32, #tpu.memory_space<vmem>>, %arg5: memref<1x1x256x128xf32, #tpu.memory_space<vmem>>, %arg6: memref<1x1x2x128xf32, #tpu.memory_space<vmem>>) attributes {dimension_semantics = [#tpu.dimension_semantics<parallel>, #tpu.dimension_semantics<parallel>, #tpu.dimension_semantics<arbitrary>], iteration_bounds = array<i64: 2, 1, 1>, scalar_prefetch = 0 : i64, scratch_operands = 0 : i64, tpu.core_type = #tpu.core_type<tc>, window_params = [{transform_indices = @transform_0, window_bounds = array<i64: 1, 18, 18, 8>}, {transform_indices = @transform_1, window_bounds = array<i64: 72, 128>}, {transform_indices = @transform_2, window_bounds = array<i64: 1, 1, 256, 128>}, {transform_indices = @transform_3, window_bounds = array<i64: 1, 1, 2, 128>}]} {
    %c16_i32 = arith.constant 16 : i32
    %0 = arith.muli %arg1, %c16_i32 : i32
    %1 = tpu.assume_multiple %0, 16 : i32
    %cst = arith.constant 0.000000e+00 : f32
    %2 = vector.broadcast %cst : f32 to vector<256x128xf32>
    %c0_i32 = arith.constant 0 : i32
    %3 = arith.addi %1, %c0_i32 : i32
    %c0 = arith.constant 0 : index
    %4 = arith.index_cast %3 : i32 to index
    %c0_0 = arith.constant 0 : index
    %c0_1 = arith.constant 0 : index
    %5 = vector.load %arg3[%c0, %4, %c0_0, %c0_1] : memref<1x18x18x8xf32, #tpu.memory_space<vmem>>, vector<1x16x16x8xf32>
    %6 = vector.shape_cast %5 : vector<1x16x16x8xf32> to vector<16x16x8xf32>
    %7 = vector.shape_cast %6 : vector<16x16x8xf32> to vector<256x8xf32>
    %c0_2 = arith.constant 0 : index
    %c0_3 = arith.constant 0 : index
    %8 = vector.load %arg4[%c0_2, %c0_3] : memref<72x128xf32, #tpu.memory_space<vmem>>, vector<8x128xf32>
    %cst_4 = arith.constant dense<0.000000e+00> : vector<256x128xf32>
    %9 = tpu.matmul %7, %8, %cst_4 {dimension_numbers = #tpu.dot_dimension_numbers<[1], [0], [0], [1], [0, 0, 1, 1], [], []>} : vector<256x8xf32>, vector<8x128xf32>, vector<256x128xf32> -> vector<256x128xf32>
    %10 = arith.addf %2, %9 : vector<256x128xf32>
    %c0_i32_5 = arith.constant 0 : i32
    %11 = arith.addi %1, %c0_i32_5 : i32
    %c0_6 = arith.constant 0 : index
    %12 = arith.index_cast %11 : i32 to index
    %c1 = arith.constant 1 : index
    %c0_7 = arith.constant 0 : index
    %13 = vector.load %arg3[%c0_6, %12, %c1, %c0_7] : memref<1x18x18x8xf32, #tpu.memory_space<vmem>>, vector<1x16x16x8xf32>
    %14 = vector.shape_cast %13 : vector<1x16x16x8xf32> to vector<16x16x8xf32>
    %15 = vector.shape_cast %14 : vector<16x16x8xf32> to vector<256x8xf32>
    %c8 = arith.constant 8 : index
    %c0_8 = arith.constant 0 : index
    %16 = vector.load %arg4[%c8, %c0_8] : memref<72x128xf32, #tpu.memory_space<vmem>>, vector<8x128xf32>
    %cst_9 = arith.constant dense<0.000000e+00> : vector<256x128xf32>
    %17 = tpu.matmul %15, %16, %cst_9 {dimension_numbers = #tpu.dot_dimension_numbers<[1], [0], [0], [1], [0, 0, 1, 1], [], []>} : vector<256x8xf32>, vector<8x128xf32>, vector<256x128xf32> -> vector<256x128xf32>
    %18 = arith.addf %10, %17 : vector<256x128xf32>
    %c0_i32_10 = arith.constant 0 : i32
    %19 = arith.addi %1, %c0_i32_10 : i32
    %c0_11 = arith.constant 0 : index
    %20 = arith.index_cast %19 : i32 to index
    %c2 = arith.constant 2 : index
    %c0_12 = arith.constant 0 : index
    %21 = vector.load %arg3[%c0_11, %20, %c2, %c0_12] : memref<1x18x18x8xf32, #tpu.memory_space<vmem>>, vector<1x16x16x8xf32>
    %22 = vector.shape_cast %21 : vector<1x16x16x8xf32> to vector<16x16x8xf32>
    %23 = vector.shape_cast %22 : vector<16x16x8xf32> to vector<256x8xf32>
    %c16 = arith.constant 16 : index
    %c0_13 = arith.constant 0 : index
    %24 = vector.load %arg4[%c16, %c0_13] : memref<72x128xf32, #tpu.memory_space<vmem>>, vector<8x128xf32>
    %cst_14 = arith.constant dense<0.000000e+00> : vector<256x128xf32>
    %25 = tpu.matmul %23, %24, %cst_14 {dimension_numbers = #tpu.dot_dimension_numbers<[1], [0], [0], [1], [0, 0, 1, 1], [], []>} : vector<256x8xf32>, vector<8x128xf32>, vector<256x128xf32> -> vector<256x128xf32>
    %26 = arith.addf %18, %25 : vector<256x128xf32>
    %c1_i32 = arith.constant 1 : i32
    %27 = arith.addi %1, %c1_i32 : i32
    %c0_15 = arith.constant 0 : index
    %28 = arith.index_cast %27 : i32 to index
    %c0_16 = arith.constant 0 : index
    %c0_17 = arith.constant 0 : index
    %29 = vector.load %arg3[%c0_15, %28, %c0_16, %c0_17] : memref<1x18x18x8xf32, #tpu.memory_space<vmem>>, vector<1x16x16x8xf32>
    %30 = vector.shape_cast %29 : vector<1x16x16x8xf32> to vector<16x16x8xf32>
    %31 = vector.shape_cast %30 : vector<16x16x8xf32> to vector<256x8xf32>
    %c24 = arith.constant 24 : index
    %c0_18 = arith.constant 0 : index
    %32 = vector.load %arg4[%c24, %c0_18] : memref<72x128xf32, #tpu.memory_space<vmem>>, vector<8x128xf32>
    %cst_19 = arith.constant dense<0.000000e+00> : vector<256x128xf32>
    %33 = tpu.matmul %31, %32, %cst_19 {dimension_numbers = #tpu.dot_dimension_numbers<[1], [0], [0], [1], [0, 0, 1, 1], [], []>} : vector<256x8xf32>, vector<8x128xf32>, vector<256x128xf32> -> vector<256x128xf32>
    %34 = arith.addf %26, %33 : vector<256x128xf32>
    %c1_i32_20 = arith.constant 1 : i32
    %35 = arith.addi %1, %c1_i32_20 : i32
    %c0_21 = arith.constant 0 : index
    %36 = arith.index_cast %35 : i32 to index
    %c1_22 = arith.constant 1 : index
    %c0_23 = arith.constant 0 : index
    %37 = vector.load %arg3[%c0_21, %36, %c1_22, %c0_23] : memref<1x18x18x8xf32, #tpu.memory_space<vmem>>, vector<1x16x16x8xf32>
    %38 = vector.shape_cast %37 : vector<1x16x16x8xf32> to vector<16x16x8xf32>
    %39 = vector.shape_cast %38 : vector<16x16x8xf32> to vector<256x8xf32>
    %c32 = arith.constant 32 : index
    %c0_24 = arith.constant 0 : index
    %40 = vector.load %arg4[%c32, %c0_24] : memref<72x128xf32, #tpu.memory_space<vmem>>, vector<8x128xf32>
    %cst_25 = arith.constant dense<0.000000e+00> : vector<256x128xf32>
    %41 = tpu.matmul %39, %40, %cst_25 {dimension_numbers = #tpu.dot_dimension_numbers<[1], [0], [0], [1], [0, 0, 1, 1], [], []>} : vector<256x8xf32>, vector<8x128xf32>, vector<256x128xf32> -> vector<256x128xf32>
    %42 = arith.addf %34, %41 : vector<256x128xf32>
    %c1_i32_26 = arith.constant 1 : i32
    %43 = arith.addi %1, %c1_i32_26 : i32
    %c0_27 = arith.constant 0 : index
    %44 = arith.index_cast %43 : i32 to index
    %c2_28 = arith.constant 2 : index
    %c0_29 = arith.constant 0 : index
    %45 = vector.load %arg3[%c0_27, %44, %c2_28, %c0_29] : memref<1x18x18x8xf32, #tpu.memory_space<vmem>>, vector<1x16x16x8xf32>
    %46 = vector.shape_cast %45 : vector<1x16x16x8xf32> to vector<16x16x8xf32>
    %47 = vector.shape_cast %46 : vector<16x16x8xf32> to vector<256x8xf32>
    %c40 = arith.constant 40 : index
    %c0_30 = arith.constant 0 : index
    %48 = vector.load %arg4[%c40, %c0_30] : memref<72x128xf32, #tpu.memory_space<vmem>>, vector<8x128xf32>
    %cst_31 = arith.constant dense<0.000000e+00> : vector<256x128xf32>
    %49 = tpu.matmul %47, %48, %cst_31 {dimension_numbers = #tpu.dot_dimension_numbers<[1], [0], [0], [1], [0, 0, 1, 1], [], []>} : vector<256x8xf32>, vector<8x128xf32>, vector<256x128xf32> -> vector<256x128xf32>
    %50 = arith.addf %42, %49 : vector<256x128xf32>
    %c2_i32 = arith.constant 2 : i32
    %51 = arith.addi %1, %c2_i32 : i32
    %c0_32 = arith.constant 0 : index
    %52 = arith.index_cast %51 : i32 to index
    %c0_33 = arith.constant 0 : index
    %c0_34 = arith.constant 0 : index
    %53 = vector.load %arg3[%c0_32, %52, %c0_33, %c0_34] : memref<1x18x18x8xf32, #tpu.memory_space<vmem>>, vector<1x16x16x8xf32>
    %54 = vector.shape_cast %53 : vector<1x16x16x8xf32> to vector<16x16x8xf32>
    %55 = vector.shape_cast %54 : vector<16x16x8xf32> to vector<256x8xf32>
    %c48 = arith.constant 48 : index
    %c0_35 = arith.constant 0 : index
    %56 = vector.load %arg4[%c48, %c0_35] : memref<72x128xf32, #tpu.memory_space<vmem>>, vector<8x128xf32>
    %cst_36 = arith.constant dense<0.000000e+00> : vector<256x128xf32>
    %57 = tpu.matmul %55, %56, %cst_36 {dimension_numbers = #tpu.dot_dimension_numbers<[1], [0], [0], [1], [0, 0, 1, 1], [], []>} : vector<256x8xf32>, vector<8x128xf32>, vector<256x128xf32> -> vector<256x128xf32>
    %58 = arith.addf %50, %57 : vector<256x128xf32>
    %c2_i32_37 = arith.constant 2 : i32
    %59 = arith.addi %1, %c2_i32_37 : i32
    %c0_38 = arith.constant 0 : index
    %60 = arith.index_cast %59 : i32 to index
    %c1_39 = arith.constant 1 : index
    %c0_40 = arith.constant 0 : index
    %61 = vector.load %arg3[%c0_38, %60, %c1_39, %c0_40] : memref<1x18x18x8xf32, #tpu.memory_space<vmem>>, vector<1x16x16x8xf32>
    %62 = vector.shape_cast %61 : vector<1x16x16x8xf32> to vector<16x16x8xf32>
    %63 = vector.shape_cast %62 : vector<16x16x8xf32> to vector<256x8xf32>
    %c56 = arith.constant 56 : index
    %c0_41 = arith.constant 0 : index
    %64 = vector.load %arg4[%c56, %c0_41] : memref<72x128xf32, #tpu.memory_space<vmem>>, vector<8x128xf32>
    %cst_42 = arith.constant dense<0.000000e+00> : vector<256x128xf32>
    %65 = tpu.matmul %63, %64, %cst_42 {dimension_numbers = #tpu.dot_dimension_numbers<[1], [0], [0], [1], [0, 0, 1, 1], [], []>} : vector<256x8xf32>, vector<8x128xf32>, vector<256x128xf32> -> vector<256x128xf32>
    %66 = arith.addf %58, %65 : vector<256x128xf32>
    %c2_i32_43 = arith.constant 2 : i32
    %67 = arith.addi %1, %c2_i32_43 : i32
    %c0_44 = arith.constant 0 : index
    %68 = arith.index_cast %67 : i32 to index
    %c2_45 = arith.constant 2 : index
    %c0_46 = arith.constant 0 : index
    %69 = vector.load %arg3[%c0_44, %68, %c2_45, %c0_46] : memref<1x18x18x8xf32, #tpu.memory_space<vmem>>, vector<1x16x16x8xf32>
    %70 = vector.shape_cast %69 : vector<1x16x16x8xf32> to vector<16x16x8xf32>
    %71 = vector.shape_cast %70 : vector<16x16x8xf32> to vector<256x8xf32>
    %c64 = arith.constant 64 : index
    %c0_47 = arith.constant 0 : index
    %72 = vector.load %arg4[%c64, %c0_47] : memref<72x128xf32, #tpu.memory_space<vmem>>, vector<8x128xf32>
    %cst_48 = arith.constant dense<0.000000e+00> : vector<256x128xf32>
    %73 = tpu.matmul %71, %72, %cst_48 {dimension_numbers = #tpu.dot_dimension_numbers<[1], [0], [0], [1], [0, 0, 1, 1], [], []>} : vector<256x8xf32>, vector<8x128xf32>, vector<256x128xf32> -> vector<256x128xf32>
    %74 = arith.addf %66, %73 : vector<256x128xf32>
    %c0_49 = arith.constant 0 : index
    %c0_50 = arith.constant 0 : index
    %c0_51 = arith.constant 0 : index
    %c0_52 = arith.constant 0 : index
    %75 = vector.load %arg5[%c0_49, %c0_50, %c0_51, %c0_52] : memref<1x1x256x128xf32, #tpu.memory_space<vmem>>, vector<1x1x256x128xf32>
    %76 = vector.shape_cast %75 : vector<1x1x256x128xf32> to vector<256x128xf32>
    %77 = vector.shape_cast %74 : vector<256x128xf32> to vector<1x1x256x128xf32>
    tpu.vector_store %arg5[%c0_49, %c0_50, %c0_51, %c0_52], %77 {strides = array<i32>} : memref<1x1x256x128xf32, #tpu.memory_space<vmem>>, vector<1x1x256x128xf32>,
    %cst_53 = arith.constant dense<0.000000e+00> : vector<128xf32>
    %78 = vector.multi_reduction <add>, %74, %cst_53 [0] : vector<256x128xf32> to vector<128xf32>
    %79 = vector.shape_cast %78 : vector<128xf32> to vector<1x128xf32>
    %cst_54 = arith.constant 3.906250e-03 : f32
    %80 = vector.broadcast %cst_54 : f32 to vector<1x128xf32>
    %81 = arith.mulf %79, %80 : vector<1x128xf32>
    %82 = vector.broadcast %81 : vector<1x128xf32> to vector<256x128xf32>
    %83 = arith.subf %74, %82 : vector<256x128xf32>
    %c0_55 = arith.constant 0 : index
    %c0_56 = arith.constant 0 : index
    %c0_57 = arith.constant 0 : index
    %c0_58 = arith.constant 0 : index
    %84 = vector.load %arg6[%c0_55, %c0_56, %c0_57, %c0_58] : memref<1x1x2x128xf32, #tpu.memory_space<vmem>>, vector<1x1x1x128xf32>
    %85 = vector.shape_cast %84 : vector<1x1x1x128xf32> to vector<1x128xf32>
    %86 = vector.shape_cast %79 : vector<1x128xf32> to vector<1x1x1x128xf32>
    tpu.vector_store %arg6[%c0_55, %c0_56, %c0_57, %c0_58], %86 {strides = array<i32>} : memref<1x1x2x128xf32, #tpu.memory_space<vmem>>, vector<1x1x1x128xf32>,
    %87 = arith.mulf %83, %83 : vector<256x128xf32>
    %cst_59 = arith.constant dense<0.000000e+00> : vector<128xf32>
    %88 = vector.multi_reduction <add>, %87, %cst_59 [0] : vector<256x128xf32> to vector<128xf32>
    %89 = vector.shape_cast %88 : vector<128xf32> to vector<1x128xf32>
    %c0_60 = arith.constant 0 : index
    %c0_61 = arith.constant 0 : index
    %c1_62 = arith.constant 1 : index
    %c0_63 = arith.constant 0 : index
    %90 = vector.load %arg6[%c0_60, %c0_61, %c1_62, %c0_63] : memref<1x1x2x128xf32, #tpu.memory_space<vmem>>, vector<1x1x1x128xf32>
    %91 = vector.shape_cast %90 : vector<1x1x1x128xf32> to vector<1x128xf32>
    %92 = vector.shape_cast %89 : vector<1x128xf32> to vector<1x1x1x128xf32>
    tpu.vector_store %arg6[%c0_60, %c0_61, %c1_62, %c0_63], %92 {strides = array<i32>} : memref<1x1x2x128xf32, #tpu.memory_space<vmem>>, vector<1x1x1x128xf32>,
    return
  }
  func.func @transform_0(%arg0: i32, %arg1: i32, %arg2: i32) -> (i32, i32, i32, i32) {
    %c0_i32 = arith.constant 0 : i32
    %c0_i32_0 = arith.constant 0 : i32
    %c0_i32_1 = arith.constant 0 : i32
    %c0_i32_2 = arith.constant 0 : i32
    return %arg0, %c0_i32, %c0_i32_0, %c0_i32_1 : i32, i32, i32, i32
  }
  func.func @transform_1(%arg0: i32, %arg1: i32, %arg2: i32) -> (i32, i32) {
    %c0_i32 = arith.constant 0 : i32
    %c0_i32_0 = arith.constant 0 : i32
    return %c0_i32, %arg2 : i32, i32
  }
  func.func @transform_2(%arg0: i32, %arg1: i32, %arg2: i32) -> (i32, i32, i32, i32) {
    %c0_i32 = arith.constant 0 : i32
    %c0_i32_0 = arith.constant 0 : i32
    return %arg0, %arg1, %c0_i32, %arg2 : i32, i32, i32, i32
  }
  func.func @transform_3(%arg0: i32, %arg1: i32, %arg2: i32) -> (i32, i32, i32, i32) {
    %c0_i32 = arith.constant 0 : i32
    %c0_i32_0 = arith.constant 0 : i32
    return %arg0, %arg1, %c0_i32, %arg2 : i32, i32, i32, i32
  }
}

module attributes {stable_mosaic.version = 11 : i64} {
  func.func @_bn_lrelu_kernel(%arg0: i32, %arg1: memref<512x128xf32, #tpu.memory_space<vmem>>, %arg2: memref<1x128xf32, #tpu.memory_space<vmem>>, %arg3: memref<1x128xf32, #tpu.memory_space<vmem>>, %arg4: memref<512x8xf32, #tpu.memory_space<vmem>>) attributes {dimension_semantics = [#tpu.dimension_semantics<parallel>], iteration_bounds = array<i64: 1>, scalar_prefetch = 0 : i64, scratch_operands = 0 : i64, tpu.core_type = #tpu.core_type<tc>, window_params = [{transform_indices = @transform_0, window_bounds = array<i64: 512, 128>}, {pipeline_mode = #tpu.pipeline_mode<synchronous>, transform_indices = @transform_1, window_bounds = array<i64: 1, 128>}, {pipeline_mode = #tpu.pipeline_mode<synchronous>, transform_indices = @transform_2, window_bounds = array<i64: 1, 128>}, {transform_indices = @transform_3, window_bounds = array<i64: 512, 8>}]} {
    %c0 = arith.constant 0 : index
    %c0_0 = arith.constant 0 : index
    %0 = vector.load %arg1[%c0, %c0_0] : memref<512x128xf32, #tpu.memory_space<vmem>>, vector<512x128xf32>
    %c0_1 = arith.constant 0 : index
    %c0_2 = arith.constant 0 : index
    %1 = vector.load %arg2[%c0_1, %c0_2] : memref<1x128xf32, #tpu.memory_space<vmem>>, vector<1x128xf32>
    %2 = vector.broadcast %1 : vector<1x128xf32> to vector<512x128xf32>
    %3 = arith.mulf %0, %2 : vector<512x128xf32>
    %c0_3 = arith.constant 0 : index
    %c0_4 = arith.constant 0 : index
    %4 = vector.load %arg3[%c0_3, %c0_4] : memref<1x128xf32, #tpu.memory_space<vmem>>, vector<1x128xf32>
    %5 = vector.broadcast %4 : vector<1x128xf32> to vector<512x128xf32>
    %6 = arith.addf %3, %5 : vector<512x128xf32>
    %cst = arith.constant 0.000000e+00 : f32
    %7 = vector.broadcast %cst : f32 to vector<512x128xf32>
    %8 = arith.cmpf ogt, %6, %7 : vector<512x128xf32>
    %cst_5 = arith.constant 1.000000e-01 : f32
    %9 = vector.broadcast %cst_5 : f32 to vector<512x128xf32>
    %10 = arith.mulf %9, %6 : vector<512x128xf32>
    %11 = arith.select %8, %6, %10 : vector<512x128xi1>, vector<512x128xf32>
    %12 = vector.extract_strided_slice %11 {offsets = [0, 0], sizes = [512, 8], strides = [1, 1]} : vector<512x128xf32> to vector<512x8xf32>
    %c0_6 = arith.constant 0 : index
    %c0_7 = arith.constant 0 : index
    %13 = vector.load %arg4[%c0_6, %c0_7] : memref<512x8xf32, #tpu.memory_space<vmem>>, vector<512x8xf32>
    tpu.vector_store %arg4[%c0_6, %c0_7], %12 {strides = array<i32>} : memref<512x8xf32, #tpu.memory_space<vmem>>, vector<512x8xf32>,
    return
  }
  func.func @transform_0(%arg0: i32) -> (i32, i32) {
    %c0_i32 = arith.constant 0 : i32
    %c0_i32_0 = arith.constant 0 : i32
    return %arg0, %c0_i32 : i32, i32
  }
  func.func @transform_1(%arg0: i32) -> (i32, i32) {
    %c0_i32 = arith.constant 0 : i32
    %c0_i32_0 = arith.constant 0 : i32
    %c0_i32_1 = arith.constant 0 : i32
    return %c0_i32, %c0_i32_0 : i32, i32
  }
  func.func @transform_2(%arg0: i32) -> (i32, i32) {
    %c0_i32 = arith.constant 0 : i32
    %c0_i32_0 = arith.constant 0 : i32
    %c0_i32_1 = arith.constant 0 : i32
    return %c0_i32, %c0_i32_0 : i32, i32
  }
  func.func @transform_3(%arg0: i32) -> (i32, i32) {
    %c0_i32 = arith.constant 0 : i32
    %c0_i32_0 = arith.constant 0 : i32
    return %arg0, %c0_i32 : i32, i32
  }
}

</mosaic_0001>

<bundles_post_ra>
// kernel: conv_block.3
= control target key start
LH: loop header
LB: loop body
LE: loop exit
PB: predicated region body
PF: predicated region fallthrough
CT: control target
= control target key end

     0   :  { %vm412_vm0 = vcmask 64512   ;;  %s1095_s0 = inlined_call_operand.vmem [shape: f32[512,128], index: 0, kind: input, shape index: {}]   ;;  %s1096_s1 = inlined_call_operand.vmem [shape: f32[1,128], index: 1, kind: input, shape index: {}]   ;;  %s1097_s2 = inlined_call_operand.vmem [shape: f32[1,128], index: 2, kind: input, shape index: {}]   ;;  %s1098_s3 = inlined_call_operand.vmem [shape: f32[512,8], index: 3, kind: output, shape index: {}]  }
   0x1   :  { %v14_v0 = vld [vmem:[%s1095_s0] sm:$0xff]  ;;  %v15_v4 = vld [vmem:[%s1095_s0 + $0x8] sm:$0xff]  ;;  %v16_v5 = vld [vmem:[%s1095_s0 + $0x10] sm:$0xff] }
   0x2   :  { %v509_v1 = vld [vmem:[%s1096_s1] ss:$0 sm:$0xff]  ;;  %v17_v6 = vld [vmem:[%s1095_s0 + $0x18] sm:$0xff]  ;;  %v19_v11 = vld [vmem:[%s1095_s0 + $0x28] sm:$0xff] }
   0x3   :  { %v514_v2 = vld [vmem:[%s1097_s2] ss:$0 sm:$0xff]  ;;  %v85_v3 = vmul.f32 %v509_v1, %v14_v0  ;;  %v86_v7 = vmul.f32 %v509_v1, %v15_v4  ;;  %v87_v8 = vmul.f32 %v509_v1, %v16_v5  ;;  %v88_v9 = vmul.f32 %v509_v1, %v17_v6  ;;  %v20_v12 = vld [vmem:[%s1095_s0 + $0x30] sm:$0xff]  ;;  %v21_v17 = vld [vmem:[%s1095_s0 + $0x38] sm:$0xff] }
   0x4   :  { %v18_v10 = vld [vmem:[%s1095_s0 + $0x20] sm:$0xff]  ;;  %v90_v15 = vmul.f32 %v509_v1, %v19_v11  ;;  %v91_v16 = vmul.f32 %v509_v1, %v20_v12  ;;  %v92_v21 = vmul.f32 %v509_v1, %v21_v17  ;;  %v23_v30 = vld [vmem:[%s1095_s0 + $0x48] sm:$0xff]  ;;  %v24_v31 = vld [vmem:[%s1095_s0 + $0x50] sm:$0xff] }
   0x5   :  { %v156_v13 = vadd.f32 %v514_v2, %v85_v3  ;;  %v89_v14 = vmul.f32 %v509_v1, %v18_v10  ;;  %v157_v18 = vadd.f32 %v514_v2, %v86_v7  ;;  %v158_v19 = vadd.f32 %v514_v2, %v87_v8  ;;  %v22_v25 = vld [vmem:[%s1095_s0 + $0x40] sm:$0xff]  ;;  %v25_v43 = vld [vmem:[%s1095_s0 + $0x58] sm:$0xff]  ;;  %v27_v45 = vld [vmem:[%s1095_s0 + $0x68] sm:$0xff] }
   0x6   :  { %v159_v20 = vadd.f32 %v514_v2, %v88_v9  ;;  %v161_v24 = vadd.f32 %v514_v2, %v90_v15  ;;  %v162_v37 = vadd.f32 %v514_v2, %v91_v16  ;;  %v163_v38 = vadd.f32 %v514_v2, %v92_v21  ;;  %v26_v44 = vld [vmem:[%s1095_s0 + $0x60] sm:$0xff]  ;;  %v28_v56 = vld [vmem:[%s1095_s0 + $0x70] sm:$0xff]  ;;  %v29_v4 = vld [vmem:[%s1095_s0 + $0x78] sm:$0xff] }
   0x7   :  { %vm220_vm1 = vcmp.gt.f32.partialorder %v156_v13, 0.0  ;;  %v284_v22 = vmul.f32 0.1, %v156_v13  ;;  %v160_v23 = vadd.f32 %v514_v2, %v89_v14  ;;  %vm221_vm2 = vcmp.gt.f32.partialorder %v157_v18, 0.0  ;;  %v30_v5 = vld [vmem:[%s1095_s0 + $0x80] sm:$0xff]  ;;  %v31_v9 = vld [vmem:[%s1095_s0 + $0x88] sm:$0xff] }
   0x8   :  { %v285_v26 = vmul.f32 0.1, %v157_v18  ;;  %vm222_vm3 = vcmp.gt.f32.partialorder %v158_v19, 0.0  ;;  %v286_v27 = vmul.f32 0.1, %v158_v19  ;;  %vm223_vm4 = vcmp.gt.f32.partialorder %v159_v20, 0.0 }
   0x9   :  { %v348_v28 = vsel %vm220_vm1, %v156_v13, %v284_v22  ;;  %v287_v29 = vmul.f32 0.1, %v159_v20  ;;  %vm224_vm5 = vcmp.gt.f32.partialorder %v160_v23, 0.0  ;;  %v288_v34 = vmul.f32 0.1, %v160_v23  ;;  %v32_v10 = vld [vmem:[%s1095_s0 + $0x90] sm:$0xff] }
   0xa   :  { %413 = vst.msk [vmem:[%s1098_s3] sm:$0xff] %vm412_vm0, %v348_v28  ;;  %v349_v32 = vsel %vm221_vm2, %v157_v18, %v285_v26  ;;  %v350_v33 = vsel %vm222_vm3, %v158_v19, %v286_v27  ;;  %vm225_vm6 = vcmp.gt.f32.partialorder %v161_v24, 0.0  ;;  %v289_v36 = vmul.f32 0.1, %v161_v24  ;;  %v33_v17 = vld [vmem:[%s1095_s0 + $0x98] sm:$0xff]  ;;  %v34_v18 = vld [vmem:[%s1095_s0 + $0xa0] sm:$0xff] }
   0xb   :  { %414 = vst.msk [vmem:[%s1098_s3 + $0x8] sm:$0xff] %vm412_vm0, %v349_v32  ;;  %415 = vst.msk [vmem:[%s1098_s3 + $0x10] sm:$0xff] %vm412_vm0, %v350_v33  ;;  %v351_v35 = vsel %vm223_vm4, %v159_v20, %v287_v29  ;;  %v352_v39 = vsel %vm224_vm5, %v160_v23, %v288_v34  ;;  %v93_v40 = vmul.f32 %v509_v1, %v22_v25  ;;  %vm226_vm7 = vcmp.gt.f32.partialorder %v162_v37, 0.0  ;;  %v35_v32 = vld [vmem:[%s1095_s0 + $0xa8] sm:$0xff]  ;;  %v36_v33 = vld [vmem:[%s1095_s0 + $0xb0] sm:$0xff] }
   0xc   :  { %416 = vst.msk [vmem:[%s1098_s3 + $0x18] sm:$0xff] %vm412_vm0, %v351_v35  ;;  %v94_v41 = vmul.f32 %v509_v1, %v23_v30  ;;  %v95_v42 = vmul.f32 %v509_v1, %v24_v31  ;;  %417 = vst.msk [vmem:[%s1098_s3 + $0x20] sm:$0xff] %vm412_vm0, %v352_v39  ;;  %v353_v46 = vsel %vm225_vm6, %v161_v24, %v289_v36  ;;  %v290_v47 = vmul.f32 0.1, %v162_v37 }
   0xd   :  { %vm227_vm8 = vcmp.gt.f32.partialorder %v163_v38, 0.0  ;;  %418 = vst.msk [vmem:[%s1098_s3 + $0x28] sm:$0xff] %vm412_vm0, %v353_v46  ;;  %v291_v48 = vmul.f32 0.1, %v163_v38  ;;  %v164_v49 = vadd.f32 %v514_v2, %v93_v40  ;;  %v96_v53 = vmul.f32 %v509_v1, %v25_v43  ;;  %v37_v40 = vld [vmem:[%s1095_s0 + $0xb8] sm:$0xff]  ;;  %v39_v46 = vld [vmem:[%s1095_s0 + $0xc8] sm:$0xff] }
   0xe   :  { %v165_v50 = vadd.f32 %v514_v2, %v94_v41  ;;  %v166_v51 = vadd.f32 %v514_v2, %v95_v42  ;;  %v354_v52 = vsel %vm226_vm7, %v162_v37, %v290_v47  ;;  %v97_v54 = vmul.f32 %v509_v1, %v26_v44  ;;  %v40_v47 = vld [vmem:[%s1095_s0 + $0xd0] sm:$0xff] }
   0xf   :  { %v98_v55 = vmul.f32 %v509_v1, %v27_v45  ;;  %419 = vst.msk [vmem:[%s1098_s3 + $0x30] sm:$0xff] %vm412_vm0, %v354_v52  ;;  %v355_v57 = vsel %vm227_vm8, %v163_v38, %v291_v48  ;;  %vm228_vm9 = vcmp.gt.f32.partialorder %v164_v49, 0.0  ;;  %v292_v58 = vmul.f32 0.1, %v164_v49  ;;  %v38_v45 = vld [vmem:[%s1095_s0 + $0xc0] sm:$0xff] }
  0x10   :  { %vm229_vm10 = vcmp.gt.f32.partialorder %v165_v50, 0.0  ;;  %420 = vst.msk [vmem:[%s1098_s3 + $0x38] sm:$0xff] %vm412_vm0, %v355_v57  ;;  %v293_v59 = vmul.f32 0.1, %v165_v50  ;;  %vm230_vm11 = vcmp.gt.f32.partialorder %v166_v51, 0.0  ;;  %v167_v61 = vadd.f32 %v514_v2, %v96_v53 }
  0x11   :  { %v294_v60 = vmul.f32 0.1, %v166_v51  ;;  %v356_v62 = vsel %vm228_vm9, %v164_v49, %v292_v58  ;;  %v168_v63 = vadd.f32 %v514_v2, %v97_v54  ;;  %v169_v0 = vadd.f32 %v514_v2, %v98_v55  ;;  %v41_v58 = vld [vmem:[%s1095_s0 + $0xd8] sm:$0xff] }
  0x12   :  { %v99_v3 = vmul.f32 %v509_v1, %v28_v56  ;;  %421 = vst.msk [vmem:[%s1098_s3 + $0x40] sm:$0xff] %vm412_vm0, %v356_v62  ;;  %v357_v6 = vsel %vm229_vm10, %v165_v50, %v293_v59  ;;  %vm231_vm12 = vcmp.gt.f32.partialorder %v167_v61, 0.0  ;;  %v295_v8 = vmul.f32 0.1, %v167_v61  ;;  %v42_v59 = vld [vmem:[%s1095_s0 + $0xe0] sm:$0xff] }
  0x13   :  { %v358_v7 = vsel %vm230_vm11, %v166_v51, %v294_v60  ;;  %422 = vst.msk [vmem:[%s1098_s3 + $0x48] sm:$0xff] %vm412_vm0, %v357_v6  ;;  %vm232_vm13 = vcmp.gt.f32.partialorder %v168_v63, 0.0  ;;  %v296_v11 = vmul.f32 0.1, %v168_v63  ;;  %vm233_vm14 = vcmp.gt.f32.partialorder %v169_v0, 0.0 }
  0x14   :  { %423 = vst.msk [vmem:[%s1098_s3 + $0x50] sm:$0xff] %vm412_vm0, %v358_v7  ;;  %v297_v12 = vmul.f32 0.1, %v169_v0  ;;  %v359_v13 = vsel %vm231_vm12, %v167_v61, %v295_v8  ;;  %v170_v14 = vadd.f32 %v514_v2, %v99_v3  ;;  %v100_v15 = vmul.f32 %v509_v1, %v29_v4 }
  0x15   :  { %v101_v16 = vmul.f32 %v509_v1, %v30_v5  ;;  %424 = vst.msk [vmem:[%s1098_s3 + $0x58] sm:$0xff] %vm412_vm0, %v359_v13  ;;  %v360_v19 = vsel %vm232_vm13, %v168_v63, %v296_v11  ;;  %v102_v21 = vmul.f32 %v509_v1, %v31_v9  ;;  %v103_v22 = vmul.f32 %v509_v1, %v32_v10  ;;  %v43_v10 = vld [vmem:[%s1095_s0 + $0xe8] sm:$0xff]  ;;  %v44_v11 = vld [vmem:[%s1095_s0 + $0xf0] sm:$0xff] }
  0x16   :  { %v361_v20 = vsel %vm233_vm14, %v169_v0, %v297_v12  ;;  %425 = vst.msk [vmem:[%s1098_s3 + $0x60] sm:$0xff] %vm412_vm0, %v360_v19  ;;  %vm234_vm15 = vcmp.gt.f32.partialorder %v170_v14, 0.0  ;;  %v298_v23 = vmul.f32 0.1, %v170_v14  ;;  %v171_v24 = vadd.f32 %v514_v2, %v100_v15 }
  0x17   :  { %426 = vst.msk [vmem:[%s1098_s3 + $0x68] sm:$0xff] %vm412_vm0, %v361_v20  ;;  %v172_v25 = vadd.f32 %v514_v2, %v101_v16  ;;  %v173_v26 = vadd.f32 %v514_v2, %v102_v21  ;;  %v174_v27 = vadd.f32 %v514_v2, %v103_v22  ;;  %v104_v28 = vmul.f32 %v509_v1, %v33_v17 }
  0x18   :  { %v105_v29 = vmul.f32 %v509_v1, %v34_v18  ;;  %v362_v30 = vsel %vm234_vm15, %v170_v14, %v298_v23  ;;  %vm235_vm1 = vcmp.gt.f32.partialorder %v171_v24, 0.0  ;;  %v299_v31 = vmul.f32 0.1, %v171_v24  ;;  %v45_v18 = vld [vmem:[%s1095_s0 + $0xf8] sm:$0xff]  ;;  %v46_v23 = vld [vmem:[%s1095_s0 + $0x100] sm:$0xff] }
  0x19   :  { %vm236_vm2 = vcmp.gt.f32.partialorder %v172_v25, 0.0  ;;  %427 = vst.msk [vmem:[%s1098_s3 + $0x70] sm:$0xff] %vm412_vm0, %v362_v30  ;;  %v300_v34 = vmul.f32 0.1, %v172_v25  ;;  %vm237_vm3 = vcmp.gt.f32.partialorder %v173_v26, 0.0  ;;  %vm238_vm4 = vcmp.gt.f32.partialorder %v174_v27, 0.0 }
  0x1a   :  { %v301_v35 = vmul.f32 0.1, %v173_v26  ;;  %v363_v36 = vsel %vm235_vm1, %v171_v24, %v299_v31  ;;  %v302_v37 = vmul.f32 0.1, %v174_v27  ;;  %v175_v38 = vadd.f32 %v514_v2, %v104_v28  ;;  %v47_v24 = vld [vmem:[%s1095_s0 + $0x108] sm:$0xff] }
  0x1b   :  { %v176_v39 = vadd.f32 %v514_v2, %v105_v29  ;;  %428 = vst.msk [vmem:[%s1098_s3 + $0x78] sm:$0xff] %vm412_vm0, %v363_v36  ;;  %v364_v41 = vsel %vm236_vm2, %v172_v25, %v300_v34  ;;  %v106_v43 = vmul.f32 %v509_v1, %v35_v32  ;;  %v107_v44 = vmul.f32 %v509_v1, %v36_v33  ;;  %v48_v25 = vld [vmem:[%s1095_s0 + $0x110] sm:$0xff]  ;;  %v49_v36 = vld [vmem:[%s1095_s0 + $0x118] sm:$0xff] }
  0x1c   :  { %v365_v42 = vsel %vm237_vm3, %v173_v26, %v301_v35  ;;  %429 = vst.msk [vmem:[%s1098_s3 + $0x80] sm:$0xff] %vm412_vm0, %v364_v41  ;;  %v366_v48 = vsel %vm238_vm4, %v174_v27, %v302_v37  ;;  %vm239_vm5 = vcmp.gt.f32.partialorder %v175_v38, 0.0  ;;  %v303_v49 = vmul.f32 0.1, %v175_v38  ;;  %v50_v37 = vld [vmem:[%s1095_s0 + $0x120] sm:$0xff] }
  0x1d   :  { %430 = vst.msk [vmem:[%s1098_s3 + $0x88] sm:$0xff] %vm412_vm0, %v365_v42  ;;  %vm240_vm6 = vcmp.gt.f32.partialorder %v176_v39, 0.0  ;;  %431 = vst.msk [vmem:[%s1098_s3 + $0x90] sm:$0xff] %vm412_vm0, %v366_v48  ;;  %v304_v50 = vmul.f32 0.1, %v176_v39  ;;  %v177_v51 = vadd.f32 %v514_v2, %v106_v43  ;;  %v178_v52 = vadd.f32 %v514_v2, %v107_v44 }
  0x1e   :  { %v108_v53 = vmul.f32 %v509_v1, %v37_v40  ;;  %v367_v54 = vsel %vm239_vm5, %v175_v38, %v303_v49  ;;  %v109_v55 = vmul.f32 %v509_v1, %v38_v45  ;;  %v110_v56 = vmul.f32 %v509_v1, %v39_v46 }
  0x1f   :  { %v111_v57 = vmul.f32 %v509_v1, %v40_v47  ;;  %432 = vst.msk [vmem:[%s1098_s3 + $0x98] sm:$0xff] %vm412_vm0, %v367_v54  ;;  %v368_v60 = vsel %vm240_vm6, %v176_v39, %v304_v50  ;;  %vm241_vm7 = vcmp.gt.f32.partialorder %v177_v51, 0.0  ;;  %v305_v61 = vmul.f32 0.1, %v177_v51  ;;  %v51_v50 = vld [vmem:[%s1095_s0 + $0x128] sm:$0xff] }
  0x20   :  { %vm242_vm8 = vcmp.gt.f32.partialorder %v178_v52, 0.0  ;;  %433 = vst.msk [vmem:[%s1098_s3 + $0xa0] sm:$0xff] %vm412_vm0, %v368_v60  ;;  %v306_v62 = vmul.f32 0.1, %v178_v52  ;;  %v179_v63 = vadd.f32 %v514_v2, %v108_v53  ;;  %v180_v0 = vadd.f32 %v514_v2, %v109_v55 }
  0x21   :  { %v181_v3 = vadd.f32 %v514_v2, %v110_v56  ;;  %v369_v4 = vsel %vm241_vm7, %v177_v51, %v305_v61  ;;  %v182_v5 = vadd.f32 %v514_v2, %v111_v57  ;;  %v112_v6 = vmul.f32 %v509_v1, %v41_v58  ;;  %v52_v51 = vld [vmem:[%s1095_s0 + $0x130] sm:$0xff]  ;;  %v53_v58 = vld [vmem:[%s1095_s0 + $0x138] sm:$0xff] }
  0x22   :  { %v113_v7 = vmul.f32 %v509_v1, %v42_v59  ;;  %434 = vst.msk [vmem:[%s1098_s3 + $0xa8] sm:$0xff] %vm412_vm0, %v369_v4  ;;  %v370_v8 = vsel %vm242_vm8, %v178_v52, %v306_v62  ;;  %vm243_vm9 = vcmp.gt.f32.partialorder %v179_v63, 0.0  ;;  %v307_v9 = vmul.f32 0.1, %v179_v63 }
  0x23   :  { %vm244_vm10 = vcmp.gt.f32.partialorder %v180_v0, 0.0  ;;  %435 = vst.msk [vmem:[%s1098_s3 + $0xb0] sm:$0xff] %vm412_vm0, %v370_v8  ;;  %v308_v12 = vmul.f32 0.1, %v180_v0  ;;  %vm245_vm11 = vcmp.gt.f32.partialorder %v181_v3, 0.0  ;;  %vm246_vm12 = vcmp.gt.f32.partialorder %v182_v5, 0.0 }
  0x24   :  { %v309_v13 = vmul.f32 0.1, %v181_v3  ;;  %v371_v14 = vsel %vm243_vm9, %v179_v63, %v307_v9  ;;  %v310_v15 = vmul.f32 0.1, %v182_v5  ;;  %v183_v16 = vadd.f32 %v514_v2, %v112_v6  ;;  %v54_v63 = vld [vmem:[%s1095_s0 + $0x140] sm:$0xff] }
  0x25   :  { %v184_v17 = vadd.f32 %v514_v2, %v113_v7  ;;  %436 = vst.msk [vmem:[%s1098_s3 + $0xb8] sm:$0xff] %vm412_vm0, %v371_v14  ;;  %v372_v19 = vsel %vm244_vm10, %v180_v0, %v308_v12  ;;  %v114_v21 = vmul.f32 %v509_v1, %v43_v10  ;;  %v115_v22 = vmul.f32 %v509_v1, %v44_v11  ;;  %v55_v0 = vld [vmem:[%s1095_s0 + $0x148] sm:$0xff]  ;;  %v57_v14 = vld [vmem:[%s1095_s0 + $0x158] sm:$0xff] }
  0x26   :  { %v373_v20 = vsel %vm245_vm11, %v181_v3, %v309_v13  ;;  %437 = vst.msk [vmem:[%s1098_s3 + $0xc0] sm:$0xff] %vm412_vm0, %v372_v19  ;;  %v374_v26 = vsel %vm246_vm12, %v182_v5, %v310_v15  ;;  %vm247_vm13 = vcmp.gt.f32.partialorder %v183_v16, 0.0  ;;  %v311_v27 = vmul.f32 0.1, %v183_v16  ;;  %v56_v3 = vld [vmem:[%s1095_s0 + $0x150] sm:$0xff]  ;;  %v58_v15 = vld [vmem:[%s1095_s0 + $0x160] sm:$0xff] }
  0x27   :  { %438 = vst.msk [vmem:[%s1098_s3 + $0xc8] sm:$0xff] %vm412_vm0, %v373_v20  ;;  %vm248_vm14 = vcmp.gt.f32.partialorder %v184_v17, 0.0  ;;  %439 = vst.msk [vmem:[%s1098_s3 + $0xd0] sm:$0xff] %vm412_vm0, %v374_v26  ;;  %v312_v28 = vmul.f32 0.1, %v184_v17  ;;  %v185_v29 = vadd.f32 %v514_v2, %v114_v21  ;;  %v186_v30 = vadd.f32 %v514_v2, %v115_v22 }
  0x28   :  { %v116_v31 = vmul.f32 %v509_v1, %v45_v18  ;;  %v375_v32 = vsel %vm247_vm13, %v183_v16, %v311_v27  ;;  %v117_v33 = vmul.f32 %v509_v1, %v46_v23  ;;  %v118_v34 = vmul.f32 %v509_v1, %v47_v24 }
  0x29   :  { %v119_v35 = vmul.f32 %v509_v1, %v48_v25  ;;  %440 = vst.msk [vmem:[%s1098_s3 + $0xd8] sm:$0xff] %vm412_vm0, %v375_v32  ;;  %v376_v38 = vsel %vm248_vm14, %v184_v17, %v312_v28  ;;  %vm249_vm15 = vcmp.gt.f32.partialorder %v185_v29, 0.0  ;;  %v313_v39 = vmul.f32 0.1, %v185_v29  ;;  %v59_v28 = vld [vmem:[%s1095_s0 + $0x168] sm:$0xff] }
  0x2a   :  { %vm250_vm1 = vcmp.gt.f32.partialorder %v186_v30, 0.0  ;;  %441 = vst.msk [vmem:[%s1098_s3 + $0xe0] sm:$0xff] %vm412_vm0, %v376_v38  ;;  %v314_v40 = vmul.f32 0.1, %v186_v30  ;;  %v187_v41 = vadd.f32 %v514_v2, %v116_v31  ;;  %v188_v42 = vadd.f32 %v514_v2, %v117_v33 }
  0x2b   :  { %v189_v43 = vadd.f32 %v514_v2, %v118_v34  ;;  %v377_v44 = vsel %vm249_vm15, %v185_v29, %v313_v39  ;;  %v190_v45 = vadd.f32 %v514_v2, %v119_v35  ;;  %v120_v46 = vmul.f32 %v509_v1, %v49_v36  ;;  %v60_v29 = vld [vmem:[%s1095_s0 + $0x170] sm:$0xff]  ;;  %v61_v36 = vld [vmem:[%s1095_s0 + $0x178] sm:$0xff] }
  0x2c   :  { %v121_v47 = vmul.f32 %v509_v1, %v50_v37  ;;  %442 = vst.msk [vmem:[%s1098_s3 + $0xe8] sm:$0xff] %vm412_vm0, %v377_v44  ;;  %v378_v48 = vsel %vm250_vm1, %v186_v30, %v314_v40  ;;  %vm251_vm2 = vcmp.gt.f32.partialorder %v187_v41, 0.0  ;;  %v315_v49 = vmul.f32 0.1, %v187_v41 }
  0x2d   :  { %vm252_vm3 = vcmp.gt.f32.partialorder %v188_v42, 0.0  ;;  %443 = vst.msk [vmem:[%s1098_s3 + $0xf0] sm:$0xff] %vm412_vm0, %v378_v48  ;;  %v316_v52 = vmul.f32 0.1, %v188_v42  ;;  %vm253_vm4 = vcmp.gt.f32.partialorder %v189_v43, 0.0  ;;  %vm254_vm5 = vcmp.gt.f32.partialorder %v190_v45, 0.0 }
  0x2e   :  { %v317_v53 = vmul.f32 0.1, %v189_v43  ;;  %v379_v54 = vsel %vm251_vm2, %v187_v41, %v315_v49  ;;  %v318_v55 = vmul.f32 0.1, %v190_v45  ;;  %v191_v56 = vadd.f32 %v514_v2, %v120_v46  ;;  %v62_v41 = vld [vmem:[%s1095_s0 + $0x180] sm:$0xff] }
  0x2f   :  { %v192_v57 = vadd.f32 %v514_v2, %v121_v47  ;;  %444 = vst.msk [vmem:[%s1098_s3 + $0xf8] sm:$0xff] %vm412_vm0, %v379_v54  ;;  %v380_v59 = vsel %vm252_vm3, %v188_v42, %v316_v52  ;;  %v122_v61 = vmul.f32 %v509_v1, %v51_v50  ;;  %v123_v62 = vmul.f32 %v509_v1, %v52_v51  ;;  %v63_v42 = vld [vmem:[%s1095_s0 + $0x188] sm:$0xff]  ;;  %v65_v54 = vld [vmem:[%s1095_s0 + $0x198] sm:$0xff] }
  0x30   :  { %v381_v60 = vsel %vm253_vm4, %v189_v43, %v317_v53  ;;  %445 = vst.msk [vmem:[%s1098_s3 + $0x100] sm:$0xff] %vm412_vm0, %v380_v59  ;;  %v382_v4 = vsel %vm254_vm5, %v190_v45, %v318_v55  ;;  %vm255_vm6 = vcmp.gt.f32.partialorder %v191_v56, 0.0  ;;  %v319_v5 = vmul.f32 0.1, %v191_v56  ;;  %v64_v43 = vld [vmem:[%s1095_s0 + $0x190] sm:$0xff]  ;;  %v66_v55 = vld [vmem:[%s1095_s0 + $0x1a0] sm:$0xff] }
  0x31   :  { %446 = vst.msk [vmem:[%s1098_s3 + $0x108] sm:$0xff] %vm412_vm0, %v381_v60  ;;  %vm256_vm7 = vcmp.gt.f32.partialorder %v192_v57, 0.0  ;;  %447 = vst.msk [vmem:[%s1098_s3 + $0x110] sm:$0xff] %vm412_vm0, %v382_v4  ;;  %v320_v6 = vmul.f32 0.1, %v192_v57  ;;  %v193_v7 = vadd.f32 %v514_v2, %v122_v61  ;;  %v194_v8 = vadd.f32 %v514_v2, %v123_v62 }
  0x32   :  { %v124_v9 = vmul.f32 %v509_v1, %v53_v58  ;;  %v383_v10 = vsel %vm255_vm6, %v191_v56, %v319_v5  ;;  %v125_v11 = vmul.f32 %v509_v1, %v54_v63  ;;  %v126_v12 = vmul.f32 %v509_v1, %v55_v0 }
  0x33   :  { %v127_v13 = vmul.f32 %v509_v1, %v56_v3  ;;  %448 = vst.msk [vmem:[%s1098_s3 + $0x118] sm:$0xff] %vm412_vm0, %v383_v10  ;;  %v384_v16 = vsel %vm256_vm7, %v192_v57, %v320_v6  ;;  %vm257_vm8 = vcmp.gt.f32.partialorder %v193_v7, 0.0  ;;  %v321_v17 = vmul.f32 0.1, %v193_v7  ;;  %v67_v6 = vld [vmem:[%s1095_s0 + $0x1a8] sm:$0xff] }
  0x34   :  { %vm258_vm9 = vcmp.gt.f32.partialorder %v194_v8, 0.0  ;;  %449 = vst.msk [vmem:[%s1098_s3 + $0x120] sm:$0xff] %vm412_vm0, %v384_v16  ;;  %v322_v18 = vmul.f32 0.1, %v194_v8  ;;  %v195_v19 = vadd.f32 %v514_v2, %v124_v9  ;;  %v196_v20 = vadd.f32 %v514_v2, %v125_v11 }
  0x35   :  { %v197_v21 = vadd.f32 %v514_v2, %v126_v12  ;;  %v385_v22 = vsel %vm257_vm8, %v193_v7, %v321_v17  ;;  %v198_v23 = vadd.f32 %v514_v2, %v127_v13  ;;  %v128_v24 = vmul.f32 %v509_v1, %v57_v14  ;;  %v68_v7 = vld [vmem:[%s1095_s0 + $0x1b0] sm:$0xff]  ;;  %v69_v14 = vld [vmem:[%s1095_s0 + $0x1b8] sm:$0xff] }
  0x36   :  { %v129_v25 = vmul.f32 %v509_v1, %v58_v15  ;;  %450 = vst.msk [vmem:[%s1098_s3 + $0x128] sm:$0xff] %vm412_vm0, %v385_v22  ;;  %v386_v26 = vsel %vm258_vm9, %v194_v8, %v322_v18  ;;  %vm259_vm10 = vcmp.gt.f32.partialorder %v195_v19, 0.0  ;;  %v323_v27 = vmul.f32 0.1, %v195_v19 }
  0x37   :  { %vm260_vm11 = vcmp.gt.f32.partialorder %v196_v20, 0.0  ;;  %451 = vst.msk [vmem:[%s1098_s3 + $0x130] sm:$0xff] %vm412_vm0, %v386_v26  ;;  %v324_v30 = vmul.f32 0.1, %v196_v20  ;;  %vm261_vm12 = vcmp.gt.f32.partialorder %v197_v21, 0.0  ;;  %vm262_vm13 = vcmp.gt.f32.partialorder %v198_v23, 0.0 }
  0x38   :  { %v325_v31 = vmul.f32 0.1, %v197_v21  ;;  %v387_v32 = vsel %vm259_vm10, %v195_v19, %v323_v27  ;;  %v326_v33 = vmul.f32 0.1, %v198_v23  ;;  %v199_v34 = vadd.f32 %v514_v2, %v128_v24  ;;  %v70_v19 = vld [vmem:[%s1095_s0 + $0x1c0] sm:$0xff] }
  0x39   :  { %v200_v35 = vadd.f32 %v514_v2, %v129_v25  ;;  %452 = vst.msk [vmem:[%s1098_s3 + $0x138] sm:$0xff] %vm412_vm0, %v387_v32  ;;  %v388_v37 = vsel %vm260_vm11, %v196_v20, %v324_v30  ;;  %v130_v39 = vmul.f32 %v509_v1, %v59_v28  ;;  %v131_v40 = vmul.f32 %v509_v1, %v60_v29  ;;  %v71_v20 = vld [vmem:[%s1095_s0 + $0x1c8] sm:$0xff]  ;;  %v73_v32 = vld [vmem:[%s1095_s0 + $0x1d8] sm:$0xff] }
  0x3a   :  { %v389_v38 = vsel %vm261_vm12, %v197_v21, %v325_v31  ;;  %453 = vst.msk [vmem:[%s1098_s3 + $0x140] sm:$0xff] %vm412_vm0, %v388_v37  ;;  %v390_v44 = vsel %vm262_vm13, %v198_v23, %v326_v33  ;;  %vm263_vm14 = vcmp.gt.f32.partialorder %v199_v34, 0.0  ;;  %v327_v45 = vmul.f32 0.1, %v199_v34  ;;  %v72_v21 = vld [vmem:[%s1095_s0 + $0x1d0] sm:$0xff]  ;;  %v74_v33 = vld [vmem:[%s1095_s0 + $0x1e0] sm:$0xff] }
  0x3b   :  { %454 = vst.msk [vmem:[%s1098_s3 + $0x148] sm:$0xff] %vm412_vm0, %v389_v38  ;;  %vm264_vm15 = vcmp.gt.f32.partialorder %v200_v35, 0.0  ;;  %455 = vst.msk [vmem:[%s1098_s3 + $0x150] sm:$0xff] %vm412_vm0, %v390_v44  ;;  %v328_v46 = vmul.f32 0.1, %v200_v35  ;;  %v201_v47 = vadd.f32 %v514_v2, %v130_v39  ;;  %v202_v48 = vadd.f32 %v514_v2, %v131_v40 }
  0x3c   :  { %v132_v49 = vmul.f32 %v509_v1, %v61_v36  ;;  %v391_v50 = vsel %vm263_vm14, %v199_v34, %v327_v45  ;;  %v133_v51 = vmul.f32 %v509_v1, %v62_v41  ;;  %v134_v52 = vmul.f32 %v509_v1, %v63_v42 }
  0x3d   :  { %v135_v53 = vmul.f32 %v509_v1, %v64_v43  ;;  %456 = vst.msk [vmem:[%s1098_s3 + $0x158] sm:$0xff] %vm412_vm0, %v391_v50  ;;  %v392_v56 = vsel %vm264_vm15, %v200_v35, %v328_v46  ;;  %vm265_vm1 = vcmp.gt.f32.partialorder %v201_v47, 0.0  ;;  %v329_v57 = vmul.f32 0.1, %v201_v47  ;;  %v75_v46 = vld [vmem:[%s1095_s0 + $0x1e8] sm:$0xff] }
  0x3e   :  { %vm266_vm2 = vcmp.gt.f32.partialorder %v202_v48, 0.0  ;;  %457 = vst.msk [vmem:[%s1098_s3 + $0x160] sm:$0xff] %vm412_vm0, %v392_v56  ;;  %v330_v58 = vmul.f32 0.1, %v202_v48  ;;  %v203_v59 = vadd.f32 %v514_v2, %v132_v49  ;;  %v204_v60 = vadd.f32 %v514_v2, %v133_v51 }
  0x3f   :  { %v205_v61 = vadd.f32 %v514_v2, %v134_v52  ;;  %v393_v62 = vsel %vm265_vm1, %v201_v47, %v329_v57  ;;  %v206_v63 = vadd.f32 %v514_v2, %v135_v53  ;;  %v136_v0 = vmul.f32 %v509_v1, %v65_v54  ;;  %v76_v47 = vld [vmem:[%s1095_s0 + $0x1f0] sm:$0xff]  ;;  %v77_v54 = vld [vmem:[%s1095_s0 + $0x1f8] sm:$0xff] }
  0x40   :  { %v137_v3 = vmul.f32 %v509_v1, %v66_v55  ;;  %458 = vst.msk [vmem:[%s1098_s3 + $0x168] sm:$0xff] %vm412_vm0, %v393_v62  ;;  %v394_v4 = vsel %vm266_vm2, %v202_v48, %v330_v58  ;;  %vm267_vm3 = vcmp.gt.f32.partialorder %v203_v59, 0.0  ;;  %v331_v5 = vmul.f32 0.1, %v203_v59 }
  0x41   :  { %vm268_vm4 = vcmp.gt.f32.partialorder %v204_v60, 0.0  ;;  %459 = vst.msk [vmem:[%s1098_s3 + $0x170] sm:$0xff] %vm412_vm0, %v394_v4  ;;  %v332_v8 = vmul.f32 0.1, %v204_v60  ;;  %vm269_vm5 = vcmp.gt.f32.partialorder %v205_v61, 0.0  ;;  %vm270_vm6 = vcmp.gt.f32.partialorder %v206_v63, 0.0 }
  0x42   :  { %v333_v9 = vmul.f32 0.1, %v205_v61  ;;  %v395_v10 = vsel %vm267_vm3, %v203_v59, %v331_v5  ;;  %v334_v11 = vmul.f32 0.1, %v206_v63  ;;  %v207_v12 = vadd.f32 %v514_v2, %v136_v0 }
  0x43   :  { %v208_v13 = vadd.f32 %v514_v2, %v137_v3  ;;  %460 = vst.msk [vmem:[%s1098_s3 + $0x178] sm:$0xff] %vm412_vm0, %v395_v10  ;;  %v396_v15 = vsel %vm268_vm4, %v204_v60, %v332_v8  ;;  %v138_v17 = vmul.f32 %v509_v1, %v67_v6  ;;  %v139_v18 = vmul.f32 %v509_v1, %v68_v7 }
  0x44   :  { %v397_v16 = vsel %vm269_vm5, %v205_v61, %v333_v9  ;;  %461 = vst.msk [vmem:[%s1098_s3 + $0x180] sm:$0xff] %vm412_vm0, %v396_v15  ;;  %v398_v22 = vsel %vm270_vm6, %v206_v63, %v334_v11  ;;  %vm271_vm7 = vcmp.gt.f32.partialorder %v207_v12, 0.0  ;;  %v335_v23 = vmul.f32 0.1, %v207_v12 }
  0x45   :  { %462 = vst.msk [vmem:[%s1098_s3 + $0x188] sm:$0xff] %vm412_vm0, %v397_v16  ;;  %vm272_vm8 = vcmp.gt.f32.partialorder %v208_v13, 0.0  ;;  %463 = vst.msk [vmem:[%s1098_s3 + $0x190] sm:$0xff] %vm412_vm0, %v398_v22  ;;  %v336_v24 = vmul.f32 0.1, %v208_v13  ;;  %v209_v25 = vadd.f32 %v514_v2, %v138_v17  ;;  %v210_v26 = vadd.f32 %v514_v2, %v139_v18 }
  0x46   :  { %v140_v27 = vmul.f32 %v509_v1, %v69_v14  ;;  %v399_v28 = vsel %vm271_vm7, %v207_v12, %v335_v23  ;;  %v141_v29 = vmul.f32 %v509_v1, %v70_v19  ;;  %v142_v30 = vmul.f32 %v509_v1, %v71_v20 }
  0x47   :  { %v143_v31 = vmul.f32 %v509_v1, %v72_v21  ;;  %464 = vst.msk [vmem:[%s1098_s3 + $0x198] sm:$0xff] %vm412_vm0, %v399_v28  ;;  %v400_v34 = vsel %vm272_vm8, %v208_v13, %v336_v24  ;;  %vm273_vm9 = vcmp.gt.f32.partialorder %v209_v25, 0.0  ;;  %v337_v35 = vmul.f32 0.1, %v209_v25 }
  0x48   :  { %vm274_vm10 = vcmp.gt.f32.partialorder %v210_v26, 0.0  ;;  %465 = vst.msk [vmem:[%s1098_s3 + $0x1a0] sm:$0xff] %vm412_vm0, %v400_v34  ;;  %v338_v36 = vmul.f32 0.1, %v210_v26  ;;  %v211_v37 = vadd.f32 %v514_v2, %v140_v27  ;;  %v212_v38 = vadd.f32 %v514_v2, %v141_v29 }
  0x49   :  { %v213_v39 = vadd.f32 %v514_v2, %v142_v30  ;;  %v401_v40 = vsel %vm273_vm9, %v209_v25, %v337_v35  ;;  %v214_v41 = vadd.f32 %v514_v2, %v143_v31  ;;  %v144_v42 = vmul.f32 %v509_v1, %v73_v32 }
  0x4a   :  { %v145_v43 = vmul.f32 %v509_v1, %v74_v33  ;;  %466 = vst.msk [vmem:[%s1098_s3 + $0x1a8] sm:$0xff] %vm412_vm0, %v401_v40  ;;  %v402_v44 = vsel %vm274_vm10, %v210_v26, %v338_v36  ;;  %vm275_vm11 = vcmp.gt.f32.partialorder %v211_v37, 0.0  ;;  %v339_v45 = vmul.f32 0.1, %v211_v37 }
  0x4b   :  { %vm276_vm12 = vcmp.gt.f32.partialorder %v212_v38, 0.0  ;;  %467 = vst.msk [vmem:[%s1098_s3 + $0x1b0] sm:$0xff] %vm412_vm0, %v402_v44  ;;  %v340_v48 = vmul.f32 0.1, %v212_v38  ;;  %vm277_vm13 = vcmp.gt.f32.partialorder %v213_v39, 0.0  ;;  %vm278_vm14 = vcmp.gt.f32.partialorder %v214_v41, 0.0 }
  0x4c   :  { %v341_v49 = vmul.f32 0.1, %v213_v39  ;;  %v403_v50 = vsel %vm275_vm11, %v211_v37, %v339_v45  ;;  %v342_v51 = vmul.f32 0.1, %v214_v41  ;;  %v215_v52 = vadd.f32 %v514_v2, %v144_v42 }
  0x4d   :  { %v216_v53 = vadd.f32 %v514_v2, %v145_v43  ;;  %468 = vst.msk [vmem:[%s1098_s3 + $0x1b8] sm:$0xff] %vm412_vm0, %v403_v50  ;;  %v404_v55 = vsel %vm276_vm12, %v212_v38, %v340_v48  ;;  %v146_v57 = vmul.f32 %v509_v1, %v75_v46  ;;  %v147_v58 = vmul.f32 %v509_v1, %v76_v47 }
  0x4e   :  { %v405_v56 = vsel %vm277_vm13, %v213_v39, %v341_v49  ;;  %469 = vst.msk [vmem:[%s1098_s3 + $0x1c0] sm:$0xff] %vm412_vm0, %v404_v55  ;;  %v406_v59 = vsel %vm278_vm14, %v214_v41, %v342_v51  ;;  %vm279_vm15 = vcmp.gt.f32.partialorder %v215_v52, 0.0  ;;  %v343_v60 = vmul.f32 0.1, %v215_v52 }
  0x4f   :  { %470 = vst.msk [vmem:[%s1098_s3 + $0x1c8] sm:$0xff] %vm412_vm0, %v405_v56  ;;  %vm280_vm1 = vcmp.gt.f32.partialorder %v216_v53, 0.0  ;;  %471 = vst.msk [vmem:[%s1098_s3 + $0x1d0] sm:$0xff] %vm412_vm0, %v406_v59  ;;  %v344_v61 = vmul.f32 0.1, %v216_v53  ;;  %v217_v62 = vadd.f32 %v514_v2, %v146_v57  ;;  %v218_v63 = vadd.f32 %v514_v2, %v147_v58 }
  0x50   :  { %v148_v0 = vmul.f32 %v509_v1, %v77_v54  ;;  %v407_v3 = vsel %vm279_vm15, %v215_v52, %v343_v60 }
  0x51   :  { %472 = vst.msk [vmem:[%s1098_s3 + $0x1d8] sm:$0xff] %vm412_vm0, %v407_v3  ;;  %v408_v4 = vsel %vm280_vm1, %v216_v53, %v344_v61  ;;  %vm281_vm2 = vcmp.gt.f32.partialorder %v217_v62, 0.0  ;;  %v345_v5 = vmul.f32 0.1, %v217_v62  ;;  %vm282_vm3 = vcmp.gt.f32.partialorder %v218_v63, 0.0 }
  0x52   :  { %473 = vst.msk [vmem:[%s1098_s3 + $0x1e0] sm:$0xff] %vm412_vm0, %v408_v4  ;;  %v346_v6 = vmul.f32 0.1, %v218_v63  ;;  %v219_v7 = vadd.f32 %v514_v2, %v148_v0 }
  0x53   :  { %v409_v8 = vsel %vm281_vm2, %v217_v62, %v345_v5 }
  0x54   :  { %474 = vst.msk [vmem:[%s1098_s3 + $0x1e8] sm:$0xff] %vm412_vm0, %v409_v8  ;;  %v410_v1 = vsel %vm282_vm3, %v218_v63, %v346_v6  ;;  %vm283_vm4 = vcmp.gt.f32.partialorder %v219_v7, 0.0  ;;  %v347_v9 = vmul.f32 0.1, %v219_v7 }
  0x55   :  { %475 = vst.msk [vmem:[%s1098_s3 + $0x1f0] sm:$0xff] %vm412_vm0, %v410_v1 }
  0x56   :  { %v411_v10 = vsel %vm283_vm4, %v219_v7, %v347_v9 }
  0x57   :  { %476 = vst.msk [vmem:[%s1098_s3 + $0x1f8] sm:$0xff] %vm412_vm0, %v411_v10 }

// kernel: conv_block.2
= control target key start
LH: loop header
LB: loop body
LE: loop exit
PB: predicated region body
PF: predicated region fallthrough
CT: control target
= control target key end

     0   :  { %s5585_s12 = smov 0   ;;  %s5587_s13 = smov 0   ;;  %s6728_s0 = inlined_call_operand.vmem [shape: f32[2,18,18,8], index: 0, kind: input, shape index: {}]   ;;  %s6729_s1 = inlined_call_operand.vmem [shape: f32[72,128], index: 1, kind: input, shape index: {}]   ;;  %s6730_s2 = inlined_call_operand.vmem [shape: f32[2,1,256,128], index: 2, kind: output, shape index: {0}]   ;;  %s6731_s3 = inlined_call_operand.vmem [shape: f32[2,1,2,128], index: 3, kind: output, shape index: {1}]  }
   0x1   :  { %s5589_s14 = smov 0  }
   0x2 LB: > { %s33_s15 = sadd.s32 1, %s5559_s13  ;;  %p4023_p0 = scmp.ge.s32.totalorder %s5563_s14, 1  ;;  %s5563_s14 = sphi %s5589_s14, %s14_s14   ;;  %s5559_s13 = sphi %s5587_s13, %s6842_s13   ;;  %s5555_s12 = sphi %s5585_s12, %s6841_s12  }
   0x3   : > { %p35_p1 = scmp.ge.s32.totalorder %s33_s15, 2  ;;  %p176_p2 = scmp.lt.s32.totalorder %s5563_s14, 3 }
   0x5   : > { %s6844_s15 = smov (%p35_p1, %s33_s15), 0  ;;  %p177_p3 = pnand %p4023_p0, %p176_p2 }
   0x7   : > { %180 = sbr.rel (%p177_p3) target bundleno = 624 (0x270), region = 28 }
   0xe   : > { %v320_v0 = vld [vmem:[%s6729_s1 + $0x8] sm:$0xff]  ;;  %v5609_v1 = vld [vmem:[%s6729_s1 + $0x20] sm:$0xff]  ;;  %p221_p4 = scmp.lt.s32.totalorder %s5555_s12, 1  ;;  %vm321_vm0 = vcmask 64512   ;;  %v2546_v9 = vld [vmem:[%s6729_s1 + $0x30] sm:$0xff] }
   0xf   : > { %v287_v2 = vld [vmem:[%s6729_s1] sm:$0xff]  ;;  %4808 = vmatprep.subr.mxu1 %v320_v0  ;;  %5008 = vmatprep.subr.mxu0 %v5609_v1  ;;  %v2157_v3 = vld [vmem:[%s6729_s1 + $0x28] sm:$0xff]  ;;  %v5644_v10 = vld [vmem:[%s6729_s1 + $0x10] sm:$0xff] }
  0x10   : > { %4809 = vmatpush3.msra.mxu1 %v320_v0  ;;  %5009 = vmatpush3.msra.mxu0 %v5609_v1  ;;  %s6846_s12 = smov (!%p221_p4, %s5555_s12), 1  ;;  %v5759_v28 = vld [vmem:[%s6729_s1 + $0x38] sm:$0xff] }
  0x11   : > { %4858 = vmatprep.subr.mxu1 %v287_v2  ;;  %5058 = vmatprep.subr.mxu0 %v2157_v3  ;;  %s5516_s24 = smul.u32 432, %s6846_s12  ;;  %v5920_v61 = vld [vmem:[%s6729_s1 + $0x18] sm:$0xff]  ;;  %s4510_s11 = sshll.u32 %s6846_s12, 8 }
  0x12   : > { %s6520_s18 = scalar_lea.vmem %s6730_s2, %s4510_s11  ;;  %s4027_s19 = sshll.u32 %s6846_s12, 1 }
  0x13   : > { %s5625_s27 = scalar_lea.vmem %s6728_s0, %s5516_s24  ;;  %s6658_s22 = scalar_lea.vmem %s6731_s3, %s4027_s19 }
  0x14   : > { %v288_v4 = vld [vmem:[%s5625_s27 + $0x1] sm:$0xff]  ;;  %v4188_v5 = vld [vmem:[%s5625_s27 + $0x19] sm:$0xff]  ;;  %v289_v6 = vld [vmem:[%s5625_s27 + $0x9] sm:$0xff] }
  0x15   : > { %4810 = vmatprep.mubr.msk.f32.mxu1 %vm321_vm0, %v288_v4  ;;  %5010 = vmatprep.mubr.msk.f32.mxu0 %vm321_vm0, %v4188_v5  ;;  %v4189_v7 = vld [vmem:[%s5625_s27 + $0x21] sm:$0xff]  ;;  %v5634_v8 = vld [vmem:[%s5625_s27 + $0x31] sm:$0xff]  ;;  %v5647_v11 = vld [vmem:[%s5625_s27 + $0x39] sm:$0xff] }
  0x16   : > { %4811 = vmatmul.mubr.msk.f32.vlgmr.msra.gmra.mrb[0].mxu1 %vm321_vm0, %v289_v6  ;;  %5011 = vmatmul.mubr.msk.f32.vlgmr.msra.gmra.mrb[0].mxu0 %vm321_vm0, %v4189_v7  ;;  %v5653_v12 = vld [vmem:[%s5625_s27 + $0x49] sm:$0xff]  ;;  %v5664_v13 = vld [vmem:[%s5625_s27 + $0x51] sm:$0xff]  ;;  %v5667_v14 = vld [vmem:[%s5625_s27 + $0x61] sm:$0xff] }
  0x17   : > { %4859 = vmatpush3.msra.mxu1 %v287_v2  ;;  %5059 = vmatpush3.msra.mxu0 %v2157_v3  ;;  %v5678_v15 = vld [vmem:[%s5625_s27 + $0x69] sm:$0xff]  ;;  %v5681_v16 = vld [vmem:[%s5625_s27 + $0x79] sm:$0xff]  ;;  %v5692_v17 = vld [vmem:[%s5625_s27 + $0x81] sm:$0xff] }
  0x18   : > { %4813 = vmatprep.mubr.msk.f32.mxu1 %vm321_vm0, %v4188_v5  ;;  %5013 = vmatprep.mubr.msk.f32.mxu0 %vm321_vm0, %v5634_v8  ;;  %v5695_v18 = vld [vmem:[%s5625_s27 + $0x91] sm:$0xff]  ;;  %v5706_v19 = vld [vmem:[%s5625_s27 + $0x99] sm:$0xff]  ;;  %v5709_v20 = vld [vmem:[%s5625_s27 + $0xa9] sm:$0xff] }
  0x19   : > { %5108 = vmatprep.subr.mxu0 %v2546_v9  ;;  %4908 = vmatprep.subr.mxu1 %v5644_v10  ;;  %v5720_v21 = vld [vmem:[%s5625_s27 + $0xb1] sm:$0xff]  ;;  %v5723_v22 = vld [vmem:[%s5625_s27 + $0xc1] sm:$0xff]  ;;  %v5734_v23 = vld [vmem:[%s5625_s27 + $0xc9] sm:$0xff] }
  0x1a   : > { %4814 = vmatmul.mubr.msk.f32.gmra.mrb[2].mxu1 %vm321_vm0, %v4189_v7  ;;  %5014 = vmatmul.mubr.msk.f32.gmra.mrb[2].mxu0 %vm321_vm0, %v5647_v11  ;;  %v5737_v24 = vld [vmem:[%s5625_s27 + $0x1a] sm:$0xff]  ;;  %v5748_v25 = vld [vmem:[%s5625_s27 + $0x22] sm:$0xff]  ;;  %v5754_v27 = vld [vmem:[%s5625_s27 + $0x32] sm:$0xff] }
  0x1b   : > { %4816 = vmatprep.mubr.msk.f32.mxu1 %vm321_vm0, %v5634_v8  ;;  %5016 = vmatprep.mubr.msk.f32.mxu0 %vm321_vm0, %v5653_v12  ;;  %v5751_v26 = vld [vmem:[%s5625_s27 + $0xd9] sm:$0xff]  ;;  %v5768_v29 = vld [vmem:[%s5625_s27 + $0xe1] sm:$0xff]  ;;  %v5776_v31 = vld [vmem:[%s5625_s27 + $0xf1] sm:$0xff] }
  0x1c   : > { %6777 = vst [vmem:[#allocation2_spill] sm:$0xff] %v5768_v29  ;;  %v5771_v30 = vld [vmem:[%s5625_s27 + $0x3a] sm:$0xff]  ;;  %6778 = vst [vmem:[#allocation3_spill] sm:$0xff] %v5776_v31  ;;  %v5779_v32 = vld [vmem:[%s5625_s27 + $0x4a] sm:$0xff] }
  0x1d   : > { %v5791_v33 = vld [vmem:[%s5625_s27 + $0xf9] sm:$0xff]  ;;  %v5797_v35 = vld [vmem:[%s5625_s27 + $0x109] sm:$0xff]  ;;  %v5811_v37 = vld [vmem:[%s5625_s27 + $0x111] sm:$0xff] }
  0x1e   : > { %4817 = vmatmul.mubr.msk.f32.gmra.mrb[4].mxu1 %vm321_vm0, %v5647_v11  ;;  %5017 = vmatmul.mubr.msk.f32.gmra.mrb[4].mxu0 %vm321_vm0, %v5664_v13  ;;  %6779 = vst [vmem:[#allocation4_spill] sm:$0xff] %v5791_v33  ;;  %v5794_v34 = vld [vmem:[%s5625_s27 + $0x52] sm:$0xff]  ;;  %6780 = vst [vmem:[#allocation5_spill] sm:$0xff] %v5797_v35  ;;  %v5800_v36 = vld [vmem:[%s5625_s27 + $0x62] sm:$0xff] }
  0x1f   : > { %4819 = vmatprep.mubr.msk.f32.mxu1 %vm321_vm0, %v5653_v12  ;;  %5019 = vmatprep.mubr.msk.f32.mxu0 %vm321_vm0, %v5667_v14  ;;  %6781 = vst [vmem:[#allocation6_spill] sm:$0xff] %v5811_v37  ;;  %v5814_v38 = vld [vmem:[%s5625_s27 + $0x6a] sm:$0xff]  ;;  %v5817_v39 = vld [vmem:[%s5625_s27 + $0x121] sm:$0xff]  ;;  %v5837_v43 = vld [vmem:[%s5625_s27 + $0x139] sm:$0xff] }
  0x20   : > { %6782 = vst [vmem:[#allocation7_spill] sm:$0xff] %v5817_v39  ;;  %v5820_v40 = vld [vmem:[%s5625_s27 + $0x7a] sm:$0xff]  ;;  %v5831_v41 = vld [vmem:[%s5625_s27 + $0x129] sm:$0xff]  ;;  %6784 = vst [vmem:[#allocation9_spill] sm:$0xff] %v5837_v43 }
  0x21   : > { %6783 = vst [vmem:[#allocation8_spill] sm:$0xff] %v5831_v41  ;;  %v5834_v42 = vld [vmem:[%s5625_s27 + $0x82] sm:$0xff]  ;;  %v5840_v44 = vld [vmem:[%s5625_s27 + $0x92] sm:$0xff]  ;;  %v5854_v46 = vld [vmem:[%s5625_s27 + $0x9a] sm:$0xff] }
  0x22   : > { %4820 = vmatmul.mubr.msk.f32.gmra.mrb[6].mxu1 %vm321_vm0, %v5664_v13  ;;  %5020 = vmatmul.mubr.msk.f32.gmra.mrb[6].mxu0 %vm321_vm0, %v5678_v15  ;;  %v5851_v45 = vld [vmem:[%s5625_s27 + $0x141] sm:$0xff]  ;;  %v5857_v47 = vld [vmem:[%s5625_s27 + $0x151] sm:$0xff]  ;;  %v5871_v49 = vld [vmem:[%s5625_s27 + $0x159] sm:$0xff] }
  0x23   : > { %4822 = vmatprep.mubr.msk.f32.mxu1 %vm321_vm0, %v5667_v14  ;;  %5022 = vmatprep.mubr.msk.f32.mxu0 %vm321_vm0, %v5681_v16  ;;  %6785 = vst [vmem:[#allocation10_spill] sm:$0xff] %v5851_v45  ;;  %6786 = vst [vmem:[#allocation11_spill] sm:$0xff] %v5857_v47  ;;  %v5860_v48 = vld [vmem:[%s5625_s27 + $0xaa] sm:$0xff]  ;;  %v5874_v50 = vld [vmem:[%s5625_s27 + $0xb2] sm:$0xff] }
  0x24   : > { %6787 = vst [vmem:[#allocation12_spill] sm:$0xff] %v5871_v49  ;;  %v5877_v51 = vld [vmem:[%s5625_s27 + $0x169] sm:$0xff]  ;;  %v5891_v53 = vld [vmem:[%s5625_s27 + $0x171] sm:$0xff]  ;;  %v255_v55 = vld [vmem:[%s5625_s27] sm:$0xff] }
  0x25   : > { %6788 = vst [vmem:[#allocation13_spill] sm:$0xff] %v5877_v51  ;;  %v5880_v52 = vld [vmem:[%s5625_s27 + $0xc2] sm:$0xff]  ;;  %6789 = vst [vmem:[#allocation14_spill] sm:$0xff] %v5891_v53  ;;  %v5894_v54 = vld [vmem:[%s5625_s27 + $0xca] sm:$0xff] }
  0x26   : > { %4823 = vmatmul.mubr.msk.f32.gmra.mrb[8].mxu1 %vm321_vm0, %v5678_v15  ;;  %5023 = vmatmul.mubr.msk.f32.gmra.mrb[8].mxu0 %vm321_vm0, %v5692_v17  ;;  %v5898_v56 = vld [vmem:[%s5625_s27 + $0xda] sm:$0xff]  ;;  %v256_v57 = vld [vmem:[%s5625_s27 + $0x8] sm:$0xff]  ;;  %v5915_v60 = vld [vmem:[%s5625_s27 + $0xf2] sm:$0xff] }
  0x27   : > { %4825 = vmatprep.mubr.msk.f32.mxu1 %vm321_vm0, %v5681_v16  ;;  %5025 = vmatprep.mubr.msk.f32.mxu0 %vm321_vm0, %v5695_v18  ;;  %v5909_v58 = vld [vmem:[%s5625_s27 + $0xe2] sm:$0xff]  ;;  %v5912_v59 = vld [vmem:[%s5625_s27 + $0x18] sm:$0xff]  ;;  %v5937_v0 = vld [vmem:[%s5625_s27 + $0x30] sm:$0xff] }
  0x28   : > { %6790 = vst [vmem:[#allocation15_spill] sm:$0xff] %v5912_v59  ;;  %v5929_v62 = vld [vmem:[%s5625_s27 + $0x20] sm:$0xff]  ;;  %6792 = vst [vmem:[#allocation17_spill] sm:$0xff] %v5937_v0  ;;  %v5940_v2 = vld [vmem:[%s5625_s27 + $0x10a] sm:$0xff] }
  0x29   : > { %6791 = vst [vmem:[#allocation16_spill] sm:$0xff] %v5929_v62  ;;  %v5932_v63 = vld [vmem:[%s5625_s27 + $0xfa] sm:$0xff]  ;;  %v5955_v4 = vld [vmem:[%s5625_s27 + $0x112] sm:$0xff]  ;;  %v5958_v5 = vld [vmem:[%s5625_s27 + $0x48] sm:$0xff] }
  0x2a   : > { %4826 = vmatmul.mubr.msk.f32.gmra.mrb[10].mxu1 %vm321_vm0, %v5692_v17  ;;  %5026 = vmatmul.mubr.msk.f32.gmra.mrb[10].mxu0 %vm321_vm0, %v5706_v19  ;;  %v5952_v3 = vld [vmem:[%s5625_s27 + $0x38] sm:$0xff]  ;;  %6794 = vst [vmem:[#allocation19_spill] sm:$0xff] %v5958_v5  ;;  %v5961_v6 = vld [vmem:[%s5625_s27 + $0x122] sm:$0xff]  ;;  %v5972_v7 = vld [vmem:[%s5625_s27 + $0x50] sm:$0xff] }
  0x2b   : > { %4828 = vmatprep.mubr.msk.f32.mxu1 %vm321_vm0, %v5695_v18  ;;  %5028 = vmatprep.mubr.msk.f32.mxu0 %vm321_vm0, %v5709_v20  ;;  %6793 = vst [vmem:[#allocation18_spill] sm:$0xff] %v5952_v3  ;;  %6795 = vst [vmem:[#allocation20_spill] sm:$0xff] %v5972_v7 }
  0x2e   : > { %4829 = vmatmul.mubr.msk.f32.gmra.mrb[12].mxu1 %vm321_vm0, %v5706_v19  ;;  %5029 = vmatmul.mubr.msk.f32.gmra.mrb[12].mxu0 %vm321_vm0, %v5720_v21 }
  0x2f   : > { %4831 = vmatprep.mubr.msk.f32.mxu1 %vm321_vm0, %v5709_v20  ;;  %5031 = vmatprep.mubr.msk.f32.mxu0 %vm321_vm0, %v5723_v22 }
  0x32   : > { %4832 = vmatmul.mubr.msk.f32.gmra.mrb[14].mxu1 %vm321_vm0, %v5720_v21  ;;  %5032 = vmatmul.mubr.msk.f32.gmra.mrb[14].mxu0 %vm321_vm0, %v5734_v23 }
  0x33   : > { %4834 = vmatprep.mubr.msk.f32.mxu1 %vm321_vm0, %v5723_v22  ;;  %5060 = vmatprep.mubr.msk.f32.mxu0 %vm321_vm0, %v5737_v24 }
  0x36   : > { %4835 = vmatmul.mubr.msk.f32.gmra.mrb[16].mxu1 %vm321_vm0, %v5734_v23  ;;  %5061 = vmatmul.mubr.msk.f32.vlgmr.msra.gmra.mrb[0].mxu0 %vm321_vm0, %v5748_v25 }
  0x37   : > { %5109 = vmatpush3.msra.mxu0 %v2546_v9  ;;  %4837 = vmatprep.mubr.msk.f32.mxu1 %vm321_vm0, %v5751_v26  ;;  %v5975_v9 = vld [vmem:[%s5625_s27 + $0x12a] sm:$0xff] }
  0x38   : > { %5063 = vmatprep.mubr.msk.f32.mxu0 %vm321_vm0, %v5754_v27  ;;  %5158 = vmatprep.subr.mxu0 %v5759_v28 }
  0x3a   : > { %4838 = vmatmul.mubr.msk.f32.gmra.mrb[18].mxu1 %vm321_vm0, %v5768_v29  ;;  %5064 = vmatmul.mubr.msk.f32.gmra.mrb[2].mxu0 %vm321_vm0, %v5771_v30  ;;  %v6072_v29 = vld [vmem:[%s5625_s27 + $0xd8] sm:$0xff] }
  0x3b   : > { %4840 = vmatprep.mubr.msk.f32.mxu1 %vm321_vm0, %v5776_v31  ;;  %5066 = vmatprep.mubr.msk.f32.mxu0 %vm321_vm0, %v5779_v32  ;;  %v6055_v31 = vld [vmem:[%s5625_s27 + $0x18a] sm:$0xff] }
  0x3c   : > { %6806 = vst [vmem:[#allocation31_spill] sm:$0xff] %v6055_v31 }
  0x3e   : > { %4841 = vmatmul.mubr.msk.f32.gmra.mrb[20].mxu1 %vm321_vm0, %v5791_v33  ;;  %5067 = vmatmul.mubr.msk.f32.gmra.mrb[4].mxu0 %vm321_vm0, %v5794_v34  ;;  %v6041_v33 = vld [vmem:[%s5625_s27 + $0x182] sm:$0xff] }
  0x3f   : > { %4843 = vmatprep.mubr.msk.f32.mxu1 %vm321_vm0, %v5797_v35  ;;  %5069 = vmatprep.mubr.msk.f32.mxu0 %vm321_vm0, %v5800_v36  ;;  %v6038_v35 = vld [vmem:[%s5625_s27 + $0xa8] sm:$0xff]  ;;  %6804 = vst [vmem:[#allocation29_spill] sm:$0xff] %v6041_v33 }
  0x40   : > { %6803 = vst [vmem:[#allocation28_spill] sm:$0xff] %v6038_v35 }
  0x42   : > { %4844 = vmatmul.mubr.msk.f32.gmra.mrb[22].mxu1 %vm321_vm0, %v5811_v37  ;;  %5070 = vmatmul.mubr.msk.f32.gmra.mrb[6].mxu0 %vm321_vm0, %v5814_v38  ;;  %v6035_v37 = vld [vmem:[%s5625_s27 + $0x172] sm:$0xff] }
  0x43   : > { %4846 = vmatprep.mubr.msk.f32.mxu1 %vm321_vm0, %v5817_v39  ;;  %5072 = vmatprep.mubr.msk.f32.mxu0 %vm321_vm0, %v5820_v40  ;;  %v6032_v39 = vld [vmem:[%s5625_s27 + $0x98] sm:$0xff]  ;;  %6802 = vst [vmem:[#allocation27_spill] sm:$0xff] %v6035_v37 }
  0x44   : > { %6801 = vst [vmem:[#allocation26_spill] sm:$0xff] %v6032_v39 }
  0x46   : > { %4847 = vmatmul.mubr.msk.f32.gmra.mrb[24].mxu1 %vm321_vm0, %v5831_v41  ;;  %5073 = vmatmul.mubr.msk.f32.gmra.mrb[8].mxu0 %vm321_vm0, %v5834_v42  ;;  %v6021_v41 = vld [vmem:[%s5625_s27 + $0x16a] sm:$0xff] }
  0x47   : > { %4849 = vmatprep.mubr.msk.f32.mxu1 %vm321_vm0, %v5837_v43  ;;  %5075 = vmatprep.mubr.msk.f32.mxu0 %vm321_vm0, %v5840_v44  ;;  %v6018_v43 = vld [vmem:[%s5625_s27 + $0x90] sm:$0xff] }
  0x48   : > { %6800 = vst [vmem:[#allocation25_spill] sm:$0xff] %v6018_v43 }
  0x4a   : > { %4850 = vmatmul.mubr.msk.f32.gmra.mrb[26].mxu1 %vm321_vm0, %v5851_v45  ;;  %5076 = vmatmul.mubr.msk.f32.gmra.mrb[10].mxu0 %vm321_vm0, %v5854_v46  ;;  %v6015_v45 = vld [vmem:[%s5625_s27 + $0x15a] sm:$0xff] }
  0x4b   : > { %4852 = vmatprep.mubr.msk.f32.mxu1 %vm321_vm0, %v5857_v47  ;;  %5078 = vmatprep.mubr.msk.f32.mxu0 %vm321_vm0, %v5860_v48  ;;  %v6012_v47 = vld [vmem:[%s5625_s27 + $0x80] sm:$0xff] }
  0x4c   : > { %6799 = vst [vmem:[#allocation24_spill] sm:$0xff] %v6012_v47 }
  0x4e   : > { %4853 = vmatmul.mubr.msk.f32.gmra.mrb[28].mxu1 %vm321_vm0, %v5871_v49  ;;  %5079 = vmatmul.mubr.msk.f32.gmra.mrb[12].mxu0 %vm321_vm0, %v5874_v50  ;;  %v6001_v49 = vld [vmem:[%s5625_s27 + $0x152] sm:$0xff] }
  0x4f   : > { %4855 = vmatprep.mubr.msk.f32.mxu1 %vm321_vm0, %v5877_v51  ;;  %5081 = vmatprep.mubr.msk.f32.mxu0 %vm321_vm0, %v5880_v52  ;;  %v5998_v51 = vld [vmem:[%s5625_s27 + $0x78] sm:$0xff] }
  0x50   : > { %6798 = vst [vmem:[#allocation23_spill] sm:$0xff] %v5998_v51 }
  0x52   : > { %4856 = vmatmul.mubr.msk.f32.gmra.mrb[30].mxu1 %vm321_vm0, %v5891_v53  ;;  %5082 = vmatmul.mubr.msk.f32.gmra.mrb[14].mxu0 %vm321_vm0, %v5894_v54  ;;  %v5995_v53 = vld [vmem:[%s5625_s27 + $0x142] sm:$0xff] }
  0x53   : > { %4860 = vmatprep.mubr.msk.f32.mxu1 %vm321_vm0, %v255_v55  ;;  %5084 = vmatprep.mubr.msk.f32.mxu0 %vm321_vm0, %v5898_v56  ;;  %v5981_v55 = vld [vmem:[%s5625_s27 + $0x13a] sm:$0xff] }
  0x56   : > { %4861 = vmatmul.mubr.msk.f32.vlgmr.msra.gmra.mrb[0].mxu1 %vm321_vm0, %v256_v57  ;;  %5085 = vmatmul.mubr.msk.f32.gmra.mrb[16].mxu0 %vm321_vm0, %v5909_v58  ;;  %v5992_v57 = vld [vmem:[%s5625_s27 + $0x68] sm:$0xff] }
  0x57   : > { %4909 = vmatpush3.msra.mxu1 %v5644_v10  ;;  %4863 = vmatprep.mubr.msk.f32.mxu1 %vm321_vm0, %v5912_v59  ;;  %v5978_v10 = vld [vmem:[%s5625_s27 + $0x60] sm:$0xff]  ;;  %6797 = vst [vmem:[#allocation22_spill] sm:$0xff] %v5992_v57 }
  0x58   : > { %5087 = vmatprep.mubr.msk.f32.mxu0 %vm321_vm0, %v5915_v60  ;;  %4958 = vmatprep.subr.mxu1 %v5920_v61  ;;  %6796 = vst [vmem:[#allocation21_spill] sm:$0xff] %v5978_v10  ;;  %v6058_v59 = vld [vmem:[%s5625_s27 + $0xc0] sm:$0xff] }
  0x5a   : > { %4864 = vmatmul.mubr.msk.f32.gmra.mrb[2].mxu1 %vm321_vm0, %v5929_v62  ;;  %5088 = vmatmul.mubr.msk.f32.gmra.mrb[18].mxu0 %vm321_vm0, %v5932_v63  ;;  %v6052_v62 = vld [vmem:[%s5625_s27 + $0xb0] sm:$0xff] }
  0x5b   : > { %4866 = vmatprep.mubr.msk.f32.mxu1 %vm321_vm0, %v5937_v0  ;;  %5090 = vmatprep.mubr.msk.f32.mxu0 %vm321_vm0, %v5940_v2  ;;  %6805 = vst [vmem:[#allocation30_spill] sm:$0xff] %v6052_v62 }
  0x5e   : > { %4867 = vmatmul.mubr.msk.f32.gmra.mrb[4].mxu1 %vm321_vm0, %v5952_v3  ;;  %5091 = vmatmul.mubr.msk.f32.gmra.mrb[20].mxu0 %vm321_vm0, %v5955_v4 }
  0x5f   : > { %4869 = vmatprep.mubr.msk.f32.mxu1 %vm321_vm0, %v5958_v5  ;;  %5093 = vmatprep.mubr.msk.f32.mxu0 %vm321_vm0, %v5961_v6 }
  0x62   : > { %4870 = vmatmul.mubr.msk.f32.gmra.mrb[6].mxu1 %vm321_vm0, %v5972_v7  ;;  %5094 = vmatmul.mubr.msk.f32.gmra.mrb[22].mxu0 %vm321_vm0, %v5975_v9 }
  0x63   : > { %4872 = vmatprep.mubr.msk.f32.mxu1 %vm321_vm0, %v5978_v10  ;;  %5096 = vmatprep.mubr.msk.f32.mxu0 %vm321_vm0, %v5981_v55 }
  0x66   : > { %4873 = vmatmul.mubr.msk.f32.gmra.mrb[8].mxu1 %vm321_vm0, %v5992_v57  ;;  %5097 = vmatmul.mubr.msk.f32.gmra.mrb[24].mxu0 %vm321_vm0, %v5995_v53 }
  0x67   : > { %4875 = vmatprep.mubr.msk.f32.mxu1 %vm321_vm0, %v5998_v51  ;;  %5099 = vmatprep.mubr.msk.f32.mxu0 %vm321_vm0, %v6001_v49 }
  0x6a   : > { %4876 = vmatmul.mubr.msk.f32.gmra.mrb[10].mxu1 %vm321_vm0, %v6012_v47  ;;  %5100 = vmatmul.mubr.msk.f32.gmra.mrb[26].mxu0 %vm321_vm0, %v6015_v45 }
  0x6b   : > { %4878 = vmatprep.mubr.msk.f32.mxu1 %vm321_vm0, %v6018_v43  ;;  %5102 = vmatprep.mubr.msk.f32.mxu0 %vm321_vm0, %v6021_v41 }
  0x6e   : > { %4879 = vmatmul.mubr.msk.f32.gmra.mrb[12].mxu1 %vm321_vm0, %v6032_v39  ;;  %5103 = vmatmul.mubr.msk.f32.gmra.mrb[28].mxu0 %vm321_vm0, %v6035_v37  ;;  %v6077_v37 = vld [vmem:[%s6729_s1 + $0x40] sm:$0xff] }
  0x6f   : > { %4881 = vmatprep.mubr.msk.f32.mxu1 %vm321_vm0, %v6038_v35  ;;  %5105 = vmatprep.mubr.msk.f32.mxu0 %vm321_vm0, %v6041_v33  ;;  %v6069_v33 = vld [vmem:[%s5625_s27 + $0xc8] sm:$0xff] }
  0x70   : > { %6807 = vst [vmem:[#allocation32_spill] sm:$0xff] %v6069_v33 }
  0x72   : > { %4882 = vmatmul.mubr.msk.f32.gmra.mrb[14].mxu1 %vm321_vm0, %v6052_v62  ;;  %5106 = vmatmul.mubr.msk.f32.gmra.mrb[30].mxu0 %vm321_vm0, %v6055_v31  ;;  %v6087_v31 = vld [vmem:[%s5625_s27 + $0xe0] sm:$0xff] }
  0x73   : > { %4884 = vmatprep.mubr.msk.f32.mxu1 %vm321_vm0, %v6058_v59  ;;  %5110 = vmatprep.mubr.msk.f32.mxu0 %vm321_vm0, %v5937_v0  ;;  %v6092_v0 = vld [vmem:[%s5625_s27 + $0xf0] sm:$0xff] }
  0x76   : > { %4885 = vmatmul.mubr.msk.f32.gmra.mrb[16].mxu1 %vm321_vm0, %v6069_v33  ;;  %5111 = vmatmul.mubr.msk.f32.vlgmr.msra.gmra.mrb[0].mxu0 %vm321_vm0, %v5952_v3  ;;  %v964_v3 = vld [vmem:[%s5625_s27 + $0x2] sm:$0xff] }
  0x77   : > { %5159 = vmatpush3.msra.mxu0 %v5759_v28  ;;  %4887 = vmatprep.mubr.msk.f32.mxu1 %vm321_vm0, %v6072_v29  ;;  %v6104_v28 = vld [vmem:[%s5625_s27 + $0xf8] sm:$0xff] }
  0x78   : > { %5113 = vmatprep.mubr.msk.f32.mxu0 %vm321_vm0, %v5958_v5  ;;  %5208 = vmatprep.subr.mxu0 %v6077_v37  ;;  %v6107_v5 = vld [vmem:[%s5625_s27 + $0x108] sm:$0xff] }
  0x7a   : > { %4888 = vmatmul.mubr.msk.f32.gmra.mrb[18].mxu1 %vm321_vm0, %v6087_v31  ;;  %5114 = vmatmul.mubr.msk.f32.gmra.mrb[2].mxu0 %vm321_vm0, %v5972_v7  ;;  %v6118_v7 = vld [vmem:[%s5625_s27 + $0x110] sm:$0xff] }
  0x7b   : > { %4890 = vmatprep.mubr.msk.f32.mxu1 %vm321_vm0, %v6092_v0  ;;  %5116 = vmatprep.mubr.msk.f32.mxu0 %vm321_vm0, %v5978_v10  ;;  %v6121_v10 = vld [vmem:[%s5625_s27 + $0x120] sm:$0xff] }
  0x7e   : > { %4891 = vmatmul.mubr.msk.f32.gmra.mrb[20].mxu1 %vm321_vm0, %v6104_v28  ;;  %5117 = vmatmul.mubr.msk.f32.gmra.mrb[4].mxu0 %vm321_vm0, %v5992_v57  ;;  %v6132_v57 = vld [vmem:[%s5625_s27 + $0x128] sm:$0xff] }
  0x7f   : > { %4893 = vmatprep.mubr.msk.f32.mxu1 %vm321_vm0, %v6107_v5  ;;  %5119 = vmatprep.mubr.msk.f32.mxu0 %vm321_vm0, %v5998_v51  ;;  %v6135_v51 = vld [vmem:[%s5625_s27 + $0x138] sm:$0xff] }
  0x82   : > { %4894 = vmatmul.mubr.msk.f32.gmra.mrb[22].mxu1 %vm321_vm0, %v6118_v7  ;;  %5120 = vmatmul.mubr.msk.f32.gmra.mrb[6].mxu0 %vm321_vm0, %v6012_v47  ;;  %v6146_v47 = vld [vmem:[%s5625_s27 + $0x140] sm:$0xff] }
  0x83   : > { %4896 = vmatprep.mubr.msk.f32.mxu1 %vm321_vm0, %v6121_v10  ;;  %5122 = vmatprep.mubr.msk.f32.mxu0 %vm321_vm0, %v6018_v43  ;;  %v6149_v43 = vld [vmem:[%s5625_s27 + $0x150] sm:$0xff] }
  0x86   : > { %4897 = vmatmul.mubr.msk.f32.gmra.mrb[24].mxu1 %vm321_vm0, %v6132_v57  ;;  %5123 = vmatmul.mubr.msk.f32.gmra.mrb[8].mxu0 %vm321_vm0, %v6032_v39  ;;  %v6160_v39 = vld [vmem:[%s5625_s27 + $0x158] sm:$0xff] }
  0x87   : > { %4899 = vmatprep.mubr.msk.f32.mxu1 %vm321_vm0, %v6135_v51  ;;  %5125 = vmatprep.mubr.msk.f32.mxu0 %vm321_vm0, %v6038_v35  ;;  %v6163_v35 = vld [vmem:[%s5625_s27 + $0x168] sm:$0xff] }
  0x8a   : > { %4900 = vmatmul.mubr.msk.f32.gmra.mrb[26].mxu1 %vm321_vm0, %v6146_v47  ;;  %5126 = vmatmul.mubr.msk.f32.gmra.mrb[10].mxu0 %vm321_vm0, %v6052_v62  ;;  %v6174_v62 = vld [vmem:[%s5625_s27 + $0x170] sm:$0xff] }
  0x8b   : > { %4902 = vmatprep.mubr.msk.f32.mxu1 %vm321_vm0, %v6149_v43  ;;  %5128 = vmatprep.mubr.msk.f32.mxu0 %vm321_vm0, %v6058_v59 }
  0x8e   : > { %4903 = vmatmul.mubr.msk.f32.gmra.mrb[28].mxu1 %vm321_vm0, %v6160_v39  ;;  %5129 = vmatmul.mubr.msk.f32.gmra.mrb[12].mxu0 %vm321_vm0, %v6069_v33  ;;  %v965_v33 = vld [vmem:[%s5625_s27 + $0xa] sm:$0xff] }
  0x8f   : > { %4905 = vmatprep.mubr.msk.f32.mxu1 %vm321_vm0, %v6163_v35  ;;  %5131 = vmatprep.mubr.msk.f32.mxu0 %vm321_vm0, %v6072_v29 }
  0x92   : > { %4906 = vmatmul.mubr.msk.f32.gmra.mrb[30].mxu1 %vm321_vm0, %v6174_v62  ;;  %5132 = vmatmul.mubr.msk.f32.gmra.mrb[14].mxu0 %vm321_vm0, %v6087_v31 }
  0x93   : > { %4910 = vmatprep.mubr.msk.f32.mxu1 %vm321_vm0, %v964_v3  ;;  %5134 = vmatprep.mubr.msk.f32.mxu0 %vm321_vm0, %v6092_v0  ;;  %v6824_v3 = vld [vmem:[#allocation22_spill] sm:$0xff] }
  0x96   : > { %4911 = vmatmul.mubr.msk.f32.vlgmr.msra.gmra.mrb[0].mxu1 %vm321_vm0, %v965_v33  ;;  %5135 = vmatmul.mubr.msk.f32.gmra.mrb[16].mxu0 %vm321_vm0, %v6104_v28  ;;  %v4346_v33 = vld [vmem:[%s5625_s27 + $0x198] sm:$0xff] }
  0x97   : > { %4959 = vmatpush3.msra.mxu1 %v5920_v61  ;;  %4913 = vmatprep.mubr.msk.f32.mxu1 %vm321_vm0, %v5737_v24  ;;  %v6227_v24 = vld [vmem:[%s5625_s27 + $0x180] sm:$0xff] }
  0x98   : > { %5137 = vmatprep.mubr.msk.f32.mxu0 %vm321_vm0, %v6107_v5  ;;  %5258 = vmatprep.subr.mxu1 %v5609_v1  ;;  %v4347_v61 = vld [vmem:[%s5625_s27 + $0x1a0] sm:$0xff] }
  0x9a   : > { %4914 = vmatmul.mubr.msk.f32.gmra.mrb[2].mxu1 %vm321_vm0, %v5748_v25  ;;  %5138 = vmatmul.mubr.msk.f32.gmra.mrb[18].mxu0 %vm321_vm0, %v6118_v7  ;;  %v6238_v25 = vld [vmem:[%s5625_s27 + $0x188] sm:$0xff] }
  0x9b   : > { %4916 = vmatprep.mubr.msk.f32.mxu1 %vm321_vm0, %v5754_v27  ;;  %5140 = vmatprep.mubr.msk.f32.mxu0 %vm321_vm0, %v6121_v10 }
  0x9e   : > { %4917 = vmatmul.mubr.msk.f32.gmra.mrb[4].mxu1 %vm321_vm0, %v5771_v30  ;;  %5141 = vmatmul.mubr.msk.f32.gmra.mrb[20].mxu0 %vm321_vm0, %v6132_v57 }
  0x9f   : > { %4919 = vmatprep.mubr.msk.f32.mxu1 %vm321_vm0, %v5779_v32  ;;  %5143 = vmatprep.mubr.msk.f32.mxu0 %vm321_vm0, %v6135_v51 }
  0xa2   : > { %4920 = vmatmul.mubr.msk.f32.gmra.mrb[6].mxu1 %vm321_vm0, %v5794_v34  ;;  %5144 = vmatmul.mubr.msk.f32.gmra.mrb[22].mxu0 %vm321_vm0, %v6146_v47 }
  0xa3   : > { %4922 = vmatprep.mubr.msk.f32.mxu1 %vm321_vm0, %v5800_v36  ;;  %5146 = vmatprep.mubr.msk.f32.mxu0 %vm321_vm0, %v6149_v43 }
  0xa6   : > { %4923 = vmatmul.mubr.msk.f32.gmra.mrb[8].mxu1 %vm321_vm0, %v5814_v38  ;;  %5147 = vmatmul.mubr.msk.f32.gmra.mrb[24].mxu0 %vm321_vm0, %v6160_v39 }
  0xa7   : > { %4925 = vmatprep.mubr.msk.f32.mxu1 %vm321_vm0, %v5820_v40  ;;  %5149 = vmatprep.mubr.msk.f32.mxu0 %vm321_vm0, %v6163_v35 }
  0xaa   : > { %4926 = vmatmul.mubr.msk.f32.gmra.mrb[10].mxu1 %vm321_vm0, %v5834_v42  ;;  %5150 = vmatmul.mubr.msk.f32.gmra.mrb[26].mxu0 %vm321_vm0, %v6174_v62 }
  0xab   : > { %4928 = vmatprep.mubr.msk.f32.mxu1 %vm321_vm0, %v5840_v44  ;;  %5152 = vmatprep.mubr.msk.f32.mxu0 %vm321_vm0, %v6227_v24 }
  0xae   : > { %4929 = vmatmul.mubr.msk.f32.gmra.mrb[12].mxu1 %vm321_vm0, %v5854_v46  ;;  %5153 = vmatmul.mubr.msk.f32.gmra.mrb[28].mxu0 %vm321_vm0, %v6238_v25 }
  0xaf   : > { %4931 = vmatprep.mubr.msk.f32.mxu1 %vm321_vm0, %v5860_v48  ;;  %5155 = vmatprep.mubr.msk.f32.mxu0 %vm321_vm0, %v4346_v33  ;;  %v6825_v33 = vld [vmem:[#allocation10_spill] sm:$0xff] }
  0xb2   : > { %4932 = vmatmul.mubr.msk.f32.gmra.mrb[14].mxu1 %vm321_vm0, %v5874_v50  ;;  %5156 = vmatmul.mubr.msk.f32.gmra.mrb[30].mxu0 %vm321_vm0, %v4347_v61  ;;  %v6826_v61 = vld [vmem:[#allocation23_spill] sm:$0xff] }
  0xb3   : > { %4934 = vmatprep.mubr.msk.f32.mxu1 %vm321_vm0, %v5880_v52  ;;  %5160 = vmatprep.mubr.msk.f32.mxu0 %vm321_vm0, %v5634_v8  ;;  %v6808_v8 = vld [vmem:[#allocation27_spill] sm:$0xff] }
  0xb6   : > { %4935 = vmatmul.mubr.msk.f32.gmra.mrb[16].mxu1 %vm321_vm0, %v5894_v54  ;;  %5161 = vmatmul.mubr.msk.f32.vlgmr.msra.gmra.mrb[0].mxu0 %vm321_vm0, %v5647_v11  ;;  %v6809_v11 = vld [vmem:[#allocation2_spill] sm:$0xff] }
  0xb7   : > { %5209 = vmatpush3.msra.mxu0 %v6077_v37  ;;  %4937 = vmatprep.mubr.msk.f32.mxu1 %vm321_vm0, %v5898_v56  ;;  %v6823_v37 = vld [vmem:[#allocation9_spill] sm:$0xff] }
  0xb8   : > { %5163 = vmatprep.mubr.msk.f32.mxu0 %vm321_vm0, %v5653_v12  ;;  %v6810_v12 = vld [vmem:[#allocation15_spill] sm:$0xff] }
  0xba   : > { %4938 = vmatmul.mubr.msk.f32.gmra.mrb[18].mxu1 %vm321_vm0, %v5909_v58  ;;  %5164 = vmatmul.mubr.msk.f32.gmra.mrb[2].mxu0 %vm321_vm0, %v5664_v13  ;;  %v6811_v13 = vld [vmem:[#allocation3_spill] sm:$0xff] }
  0xbb   : > { %4940 = vmatprep.mubr.msk.f32.mxu1 %vm321_vm0, %v5915_v60  ;;  %5166 = vmatprep.mubr.msk.f32.mxu0 %vm321_vm0, %v5667_v14  ;;  %v6812_v14 = vld [vmem:[#allocation16_spill] sm:$0xff] }
  0xbe   : > { %4941 = vmatmul.mubr.msk.f32.gmra.mrb[20].mxu1 %vm321_vm0, %v5932_v63  ;;  %5167 = vmatmul.mubr.msk.f32.gmra.mrb[4].mxu0 %vm321_vm0, %v5678_v15  ;;  %v6813_v15 = vld [vmem:[#allocation4_spill] sm:$0xff] }
  0xbf   : > { %4943 = vmatprep.mubr.msk.f32.mxu1 %vm321_vm0, %v5940_v2  ;;  %5169 = vmatprep.mubr.msk.f32.mxu0 %vm321_vm0, %v5681_v16  ;;  %v6814_v16 = vld [vmem:[#allocation17_spill] sm:$0xff] }
  0xc2   : > { %4944 = vmatmul.mubr.msk.f32.gmra.mrb[22].mxu1 %vm321_vm0, %v5955_v4  ;;  %5170 = vmatmul.mubr.msk.f32.gmra.mrb[6].mxu0 %vm321_vm0, %v5692_v17  ;;  %v6815_v17 = vld [vmem:[#allocation5_spill] sm:$0xff] }
  0xc3   : > { %4946 = vmatprep.mubr.msk.f32.mxu1 %vm321_vm0, %v5961_v6  ;;  %5172 = vmatprep.mubr.msk.f32.mxu0 %vm321_vm0, %v5695_v18  ;;  %v6816_v18 = vld [vmem:[#allocation18_spill] sm:$0xff] }
  0xc6   : > { %4947 = vmatmul.mubr.msk.f32.gmra.mrb[24].mxu1 %vm321_vm0, %v5975_v9  ;;  %5173 = vmatmul.mubr.msk.f32.gmra.mrb[8].mxu0 %vm321_vm0, %v5706_v19  ;;  %v6817_v19 = vld [vmem:[#allocation6_spill] sm:$0xff] }
  0xc7   : > { %4949 = vmatprep.mubr.msk.f32.mxu1 %vm321_vm0, %v5981_v55  ;;  %5175 = vmatprep.mubr.msk.f32.mxu0 %vm321_vm0, %v5709_v20  ;;  %v6818_v20 = vld [vmem:[#allocation19_spill] sm:$0xff] }
  0xca   : > { %4950 = vmatmul.mubr.msk.f32.gmra.mrb[26].mxu1 %vm321_vm0, %v5995_v53  ;;  %5176 = vmatmul.mubr.msk.f32.gmra.mrb[10].mxu0 %vm321_vm0, %v5720_v21  ;;  %v6819_v21 = vld [vmem:[#allocation7_spill] sm:$0xff] }
  0xcb   : > { %4952 = vmatprep.mubr.msk.f32.mxu1 %vm321_vm0, %v6001_v49  ;;  %5178 = vmatprep.mubr.msk.f32.mxu0 %vm321_vm0, %v5723_v22  ;;  %v6821_v22 = vld [vmem:[#allocation8_spill] sm:$0xff] }
  0xce   : > { %4953 = vmatmul.mubr.msk.f32.gmra.mrb[28].mxu1 %vm321_vm0, %v6015_v45  ;;  %5179 = vmatmul.mubr.msk.f32.gmra.mrb[12].mxu0 %vm321_vm0, %v5734_v23  ;;  %v6822_v23 = vld [vmem:[#allocation21_spill] sm:$0xff] }
  0xcf   : > { %4955 = vmatprep.mubr.msk.f32.mxu1 %vm321_vm0, %v6021_v41  ;;  %5181 = vmatprep.mubr.msk.f32.mxu0 %vm321_vm0, %v5751_v26 }
  0xd2   : > { %4956 = vmatmul.mubr.msk.f32.gmra.mrb[30].mxu1 %vm321_vm0, %v6808_v8  ;;  %5182 = vmatmul.mubr.msk.f32.gmra.mrb[14].mxu0 %vm321_vm0, %v6809_v11  ;;  %v6835_v8 = vld [vmem:[#allocation30_spill] sm:$0xff] }
  0xd3   : > { %4960 = vmatprep.mubr.msk.f32.mxu1 %vm321_vm0, %v6810_v12  ;;  %5184 = vmatprep.mubr.msk.f32.mxu0 %vm321_vm0, %v6811_v13  ;;  %v6827_v12 = vld [vmem:[#allocation11_spill] sm:$0xff] }
  0xd6   : > { %4961 = vmatmul.mubr.msk.f32.vlgmr.msra.gmra.mrb[0].mxu1 %vm321_vm0, %v6812_v14  ;;  %5185 = vmatmul.mubr.msk.f32.gmra.mrb[16].mxu0 %vm321_vm0, %v6813_v15  ;;  %v6828_v14 = vld [vmem:[#allocation24_spill] sm:$0xff] }
  0xd7   : > { %5259 = vmatpush3.msra.mxu1 %v5609_v1  ;;  %4963 = vmatprep.mubr.msk.f32.mxu1 %vm321_vm0, %v6814_v16  ;;  %v6820_v1 = vld [vmem:[#allocation20_spill] sm:$0xff] }
  0xd8   : > { %5187 = vmatprep.mubr.msk.f32.mxu0 %vm321_vm0, %v6815_v17  ;;  %v6829_v16 = vld [vmem:[#allocation12_spill] sm:$0xff] }
  0xda   : > { %4964 = vmatmul.mubr.msk.f32.gmra.mrb[2].mxu1 %vm321_vm0, %v6816_v18  ;;  %5188 = vmatmul.mubr.msk.f32.gmra.mrb[18].mxu0 %vm321_vm0, %v6817_v19  ;;  %v6830_v18 = vld [vmem:[#allocation25_spill] sm:$0xff] }
  0xdb   : > { %4966 = vmatprep.mubr.msk.f32.mxu1 %vm321_vm0, %v6818_v20  ;;  %5190 = vmatprep.mubr.msk.f32.mxu0 %vm321_vm0, %v6819_v21  ;;  %v6831_v20 = vld [vmem:[#allocation13_spill] sm:$0xff] }
  0xde   : > { %4967 = vmatmul.mubr.msk.f32.gmra.mrb[4].mxu1 %vm321_vm0, %v6820_v1  ;;  %5191 = vmatmul.mubr.msk.f32.gmra.mrb[20].mxu0 %vm321_vm0, %v6821_v22  ;;  %v6363_v1 = vld [vmem:[%s5625_s27 + $0x181] sm:$0xff] }
  0xdf   : > { %4969 = vmatprep.mubr.msk.f32.mxu1 %vm321_vm0, %v6822_v23  ;;  %5193 = vmatprep.mubr.msk.f32.mxu0 %vm321_vm0, %v6823_v37  ;;  %v6832_v23 = vld [vmem:[#allocation26_spill] sm:$0xff] }
  0xe2   : > { %4970 = vmatmul.mubr.msk.f32.gmra.mrb[6].mxu1 %vm321_vm0, %v6824_v3  ;;  %5194 = vmatmul.mubr.msk.f32.gmra.mrb[22].mxu0 %vm321_vm0, %v6825_v33  ;;  %v6833_v3 = vld [vmem:[#allocation14_spill] sm:$0xff] }
  0xe3   : > { %4972 = vmatprep.mubr.msk.f32.mxu1 %vm321_vm0, %v6826_v61  ;;  %5196 = vmatprep.mubr.msk.f32.mxu0 %vm321_vm0, %v6827_v12  ;;  %v6834_v61 = vld [vmem:[#allocation28_spill] sm:$0xff] }
  0xe6   : > { %4973 = vmatmul.mubr.msk.f32.gmra.mrb[8].mxu1 %vm321_vm0, %v6828_v14  ;;  %5197 = vmatmul.mubr.msk.f32.gmra.mrb[24].mxu0 %vm321_vm0, %v6829_v16  ;;  %v6374_v14 = vld [vmem:[%s5625_s27 + $0x189] sm:$0xff] }
  0xe7   : > { %4975 = vmatprep.mubr.msk.f32.mxu1 %vm321_vm0, %v6830_v18  ;;  %5199 = vmatprep.mubr.msk.f32.mxu0 %vm321_vm0, %v6831_v20  ;;  %v4410_v18 = vld [vmem:[%s5625_s27 + $0x199] sm:$0xff] }
  0xea   : > { %4976 = vmatmul.mubr.msk.f32.gmra.mrb[10].mxu1 %vm321_vm0, %v6832_v23  ;;  %5200 = vmatmul.mubr.msk.f32.gmra.mrb[26].mxu0 %vm321_vm0, %v6833_v3  ;;  %v4411_v23 = vld [vmem:[%s5625_s27 + $0x1a1] sm:$0xff]  ;;  %v6836_v3 = vld [vmem:[#allocation32_spill] sm:$0xff] }
  0xeb   : > { %4978 = vmatprep.mubr.msk.f32.mxu1 %vm321_vm0, %v6834_v61  ;;  %5202 = vmatprep.mubr.msk.f32.mxu0 %vm321_vm0, %v6363_v1 }
  0xee   : > { %4979 = vmatmul.mubr.msk.f32.gmra.mrb[12].mxu1 %vm321_vm0, %v6835_v8  ;;  %5203 = vmatmul.mubr.msk.f32.gmra.mrb[28].mxu0 %vm321_vm0, %v6374_v14 }
  0xef   : > { %4981 = vmatprep.mubr.msk.f32.mxu1 %vm321_vm0, %v6058_v59  ;;  %5205 = vmatprep.mubr.msk.f32.mxu0 %vm321_vm0, %v4410_v18 }
  0xf2   : > { %4982 = vmatmul.mubr.msk.f32.gmra.mrb[14].mxu1 %vm321_vm0, %v6836_v3  ;;  %5206 = vmatmul.mubr.msk.f32.gmra.mrb[30].mxu0 %vm321_vm0, %v4411_v23 }
  0xf3   : > { %4984 = vmatprep.mubr.msk.f32.mxu1 %vm321_vm0, %v6072_v29  ;;  %5210 = vmatprep.mubr.msk.f32.mxu0 %vm321_vm0, %v5754_v27  ;;  %v6838_v27 = vld [vmem:[#allocation29_spill] sm:$0xff] }
  0xf4   : > { %v4474_v29 = vld [vmem:[%s5625_s27 + $0x19a] sm:$0xff] }
  0xf6   : > { %4985 = vmatmul.mubr.msk.f32.gmra.mrb[16].mxu1 %vm321_vm0, %v6087_v31  ;;  %5211 = vmatmul.mubr.msk.f32.vlgmr.msra.gmra.mrb[0].mxu0 %vm321_vm0, %v5771_v30  ;;  %v6839_v30 = vld [vmem:[#allocation14_spill] sm:$0xff]  ;;  %v6840_v31 = vld [vmem:[#allocation31_spill] sm:$0xff] }
  0xf7   : > { %4987 = vmatprep.mubr.msk.f32.mxu1 %vm321_vm0, %v6092_v0  ;;  %5213 = vmatprep.mubr.msk.f32.mxu0 %vm321_vm0, %v5779_v32  ;;  %v4475_v32 = vld [vmem:[%s5625_s27 + $0x1a2] sm:$0xff] }
  0xfa   : > { %4988 = vmatmul.mubr.msk.f32.gmra.mrb[18].mxu1 %vm321_vm0, %v6104_v28  ;;  %5214 = vmatmul.mubr.msk.f32.gmra.mrb[2].mxu0 %vm321_vm0, %v5794_v34 }
  0xfb   : > { %4990 = vmatprep.mubr.msk.f32.mxu1 %vm321_vm0, %v6107_v5  ;;  %5216 = vmatprep.mubr.msk.f32.mxu0 %vm321_vm0, %v5800_v36 }
  0xfe   : > { %4991 = vmatmul.mubr.msk.f32.gmra.mrb[20].mxu1 %vm321_vm0, %v6118_v7  ;;  %5217 = vmatmul.mubr.msk.f32.gmra.mrb[4].mxu0 %vm321_vm0, %v5814_v38 }
  0xff   : > { %4993 = vmatprep.mubr.msk.f32.mxu1 %vm321_vm0, %v6121_v10  ;;  %5219 = vmatprep.mubr.msk.f32.mxu0 %vm321_vm0, %v5820_v40 }
 0x102   : > { %4994 = vmatmul.mubr.msk.f32.gmra.mrb[22].mxu1 %vm321_vm0, %v6132_v57  ;;  %5220 = vmatmul.mubr.msk.f32.gmra.mrb[6].mxu0 %vm321_vm0, %v5834_v42 }
 0x103   : > { %4996 = vmatprep.mubr.msk.f32.mxu1 %vm321_vm0, %v6135_v51  ;;  %5222 = vmatprep.mubr.msk.f32.mxu0 %vm321_vm0, %v5840_v44 }
 0x106   : > { %4997 = vmatmul.mubr.msk.f32.gmra.mrb[24].mxu1 %vm321_vm0, %v6146_v47  ;;  %5223 = vmatmul.mubr.msk.f32.gmra.mrb[8].mxu0 %vm321_vm0, %v5854_v46 }
 0x107   : > { %4999 = vmatprep.mubr.msk.f32.mxu1 %vm321_vm0, %v6149_v43  ;;  %5225 = vmatprep.mubr.msk.f32.mxu0 %vm321_vm0, %v5860_v48 }
 0x10a   : > { %5000 = vmatmul.mubr.msk.f32.gmra.mrb[26].mxu1 %vm321_vm0, %v6160_v39  ;;  %5226 = vmatmul.mubr.msk.f32.gmra.mrb[10].mxu0 %vm321_vm0, %v5874_v50 }
 0x10b   : > { %5002 = vmatprep.mubr.msk.f32.mxu1 %vm321_vm0, %v6163_v35  ;;  %5228 = vmatprep.mubr.msk.f32.mxu0 %vm321_vm0, %v5880_v52 }
 0x10e   : > { %5003 = vmatmul.mubr.msk.f32.gmra.mrb[28].mxu1 %vm321_vm0, %v6174_v62  ;;  %5229 = vmatmul.mubr.msk.f32.gmra.mrb[12].mxu0 %vm321_vm0, %v5894_v54 }
 0x10f   : > { %5005 = vmatprep.mubr.msk.f32.mxu1 %vm321_vm0, %v6227_v24  ;;  %5231 = vmatprep.mubr.msk.f32.mxu0 %vm321_vm0, %v5898_v56 }
 0x112   : > { %5006 = vmatmul.mubr.msk.f32.gmra.mrb[30].mxu1 %vm321_vm0, %v6238_v25  ;;  %5232 = vmatmul.mubr.msk.f32.gmra.mrb[14].mxu0 %vm321_vm0, %v5909_v58 }
 0x113   : > { %5034 = vmatprep.mubr.msk.f32.mxu1 %vm321_vm0, %v5751_v26  ;;  %5234 = vmatprep.mubr.msk.f32.mxu0 %vm321_vm0, %v5915_v60  ;;  %v6837_v26 = vld [vmem:[#allocation27_spill] sm:$0xff] }
 0x116   : > { %5035 = vmatmul.mubr.msk.f32.vlgmr.msra.gmra.mrb[16].mxu1 %vm321_vm0, %v6809_v11  ;;  %5235 = vmatmul.mubr.msk.f32.gmra.mrb[16].mxu0 %vm321_vm0, %v5932_v63 }
 0x117   : > { %5037 = vmatprep.mubr.msk.f32.mxu1 %vm321_vm0, %v6811_v13  ;;  %5237 = vmatprep.mubr.msk.f32.mxu0 %vm321_vm0, %v5940_v2 }
 0x11a   : > { %5038 = vmatmul.mubr.msk.f32.gmra.mrb[18].mxu1 %vm321_vm0, %v6813_v15  ;;  %5238 = vmatmul.mubr.msk.f32.gmra.mrb[18].mxu0 %vm321_vm0, %v5955_v4 }
 0x11b   : > { %5040 = vmatprep.mubr.msk.f32.mxu1 %vm321_vm0, %v6815_v17  ;;  %5240 = vmatprep.mubr.msk.f32.mxu0 %vm321_vm0, %v5961_v6 }
 0x11e   : > { %5041 = vmatmul.mubr.msk.f32.gmra.mrb[20].mxu1 %vm321_vm0, %v6817_v19  ;;  %5241 = vmatmul.mubr.msk.f32.gmra.mrb[20].mxu0 %vm321_vm0, %v5975_v9 }
 0x11f   : > { %5043 = vmatprep.mubr.msk.f32.mxu1 %vm321_vm0, %v6819_v21  ;;  %5243 = vmatprep.mubr.msk.f32.mxu0 %vm321_vm0, %v5981_v55 }
 0x122   : > { %5044 = vmatmul.mubr.msk.f32.gmra.mrb[22].mxu1 %vm321_vm0, %v6821_v22  ;;  %5244 = vmatmul.mubr.msk.f32.gmra.mrb[22].mxu0 %vm321_vm0, %v5995_v53 }
 0x123   : > { %5046 = vmatprep.mubr.msk.f32.mxu1 %vm321_vm0, %v6823_v37  ;;  %5246 = vmatprep.mubr.msk.f32.mxu0 %vm321_vm0, %v6001_v49 }
 0x126   : > { %5047 = vmatmul.mubr.msk.f32.gmra.mrb[24].mxu1 %vm321_vm0, %v6825_v33  ;;  %5247 = vmatmul.mubr.msk.f32.gmra.mrb[24].mxu0 %vm321_vm0, %v6015_v45 }
 0x127   : > { %5049 = vmatprep.mubr.msk.f32.mxu1 %vm321_vm0, %v6827_v12  ;;  %5249 = vmatprep.mubr.msk.f32.mxu0 %vm321_vm0, %v6021_v41 }
 0x12a   : > { %5050 = vmatmul.mubr.msk.f32.gmra.mrb[26].mxu1 %vm321_vm0, %v6829_v16  ;;  %5250 = vmatmul.mubr.msk.f32.gmra.mrb[26].mxu0 %vm321_vm0, %v6837_v26 }
 0x12b   : > { %5052 = vmatprep.mubr.msk.f32.mxu1 %vm321_vm0, %v6831_v20  ;;  %5252 = vmatprep.mubr.msk.f32.mxu0 %vm321_vm0, %v6838_v27 }
 0x12e   : > { %5053 = vmatmul.mubr.msk.f32.gmra.mrb[28].mxu1 %vm321_vm0, %v6839_v30  ;;  %5253 = vmatmul.mubr.msk.f32.gmra.mrb[28].mxu0 %vm321_vm0, %v6840_v31 }
 0x12f   : > { %5055 = vmatprep.mubr.msk.f32.mxu1 %vm321_vm0, %v6363_v1  ;;  %5255 = vmatprep.mubr.msk.f32.mxu0 %vm321_vm0, %v4474_v29 }
 0x132   : > { %5056 = vmatmul.mubr.msk.f32.gmra.mrb[30].mxu1 %vm321_vm0, %v6374_v14  ;;  %5256 = vmatmul.mubr.msk.f32.gmra.mrb[30].mxu0 %vm321_vm0, %v4475_v32 }
 0x1a9   : > { %v4962_v34 = vpop.f32.mrb[0].mxu1 }
 0x1aa   : > { %v1548_v35 = vpop.f32.mrb[1].mxu1 }
 0x1ad   : > { %v4965_v36 = vpop.f32.mrb[2].mxu1 }
 0x1ae   : > { %v1558_v38 = vpop.f32.mrb[3].mxu1 }
 0x1b1   : > { %v4968_v39 = vpop.f32.mrb[4].mxu1 }
 0x1b2   : > { %v1568_v40 = vpop.f32.mrb[5].mxu1 }
 0x1b5   : > { %v4971_v41 = vpop.f32.mrb[6].mxu1 }
 0x1b6   : > { %v1578_v42 = vpop.f32.mrb[7].mxu1 }
 0x1b9   : > { %v4974_v43 = vpop.f32.mrb[8].mxu1 }
 0x1ba   : > { %v1588_v44 = vpop.f32.mrb[9].mxu1 }
 0x1bd   : > { %v4977_v45 = vpop.f32.mrb[10].mxu1 }
 0x1be   : > { %v1598_v46 = vpop.f32.mrb[11].mxu1 }
 0x1c1   : > { %v4980_v47 = vpop.f32.mrb[12].mxu1 }
 0x1c2   : > { %v1608_v48 = vpop.f32.mrb[13].mxu1 }
 0x1c5   : > { %v4983_v49 = vpop.f32.mrb[14].mxu1 }
 0x1c6   : > { %v1618_v50 = vpop.f32.mrb[15].mxu1 }
 0x1c9   : > { %v5212_v51 = vpop.f32.mrb[0].mxu0 }
 0x1ca   : > { %v6522_v52 = vadd.f32 %v5212_v51, %v4962_v34  ;;  %v3481_v53 = vpop.f32.mrb[1].mxu0 }
 0x1cb   : > { %v6524_v54 = vadd.f32 %v3481_v53, %v1548_v35 }
 0x1cc   : > { %3673 = vst [vmem:[%s6520_s18 + $0x8] sm:$0xff] %v6522_v52 }
 0x1cd   : > { %3672 = vst [vmem:[%s6520_s18] sm:$0xff] %v6524_v54  ;;  %v5215_v56 = vpop.f32.mrb[2].mxu0  ;;  %v3704_v60 = vadd.f32 %v6524_v54, %v6522_v52 }
 0x1ce   : > { %v6530_v58 = vadd.f32 %v5215_v56, %v4965_v36  ;;  %v3491_v59 = vpop.f32.mrb[3].mxu0 }
 0x1cf   : > { %v6534_v62 = vadd.f32 %v3491_v59, %v1558_v38 }
 0x1d0   : > { %3675 = vst [vmem:[%s6520_s18 + $0x18] sm:$0xff] %v6530_v58 }
 0x1d1   : > { %3674 = vst [vmem:[%s6520_s18 + $0x10] sm:$0xff] %v6534_v62  ;;  %v3705_v63 = vadd.f32 %v6534_v62, %v3704_v60  ;;  %v5218_v0 = vpop.f32.mrb[4].mxu0 }
 0x1d2   : > { %v6541_v2 = vadd.f32 %v5218_v0, %v4968_v39  ;;  %v3501_v4 = vpop.f32.mrb[5].mxu0 }
 0x1d3   : > { %v6543_v5 = vadd.f32 %v3501_v4, %v1568_v40  ;;  %v3706_v6 = vadd.f32 %v6530_v58, %v3705_v63 }
 0x1d4   : > { %3677 = vst [vmem:[%s6520_s18 + $0x28] sm:$0xff] %v6541_v2 }
 0x1d5   : > { %3676 = vst [vmem:[%s6520_s18 + $0x20] sm:$0xff] %v6543_v5  ;;  %v3707_v7 = vadd.f32 %v6543_v5, %v3706_v6  ;;  %v5221_v9 = vpop.f32.mrb[6].mxu0 }
 0x1d6   : > { %v6551_v10 = vadd.f32 %v5221_v9, %v4971_v41  ;;  %v3511_v55 = vpop.f32.mrb[7].mxu0 }
 0x1d7   : > { %v6553_v57 = vadd.f32 %v3511_v55, %v1578_v42  ;;  %v3708_v28 = vadd.f32 %v6541_v2, %v3707_v7 }
 0x1d8   : > { %3679 = vst [vmem:[%s6520_s18 + $0x38] sm:$0xff] %v6551_v10 }
 0x1d9   : > { %3678 = vst [vmem:[%s6520_s18 + $0x30] sm:$0xff] %v6553_v57  ;;  %v3709_v24 = vadd.f32 %v6553_v57, %v3708_v28  ;;  %v5224_v25 = vpop.f32.mrb[8].mxu0 }
 0x1da   : > { %v6561_v8 = vadd.f32 %v5224_v25, %v4974_v43  ;;  %v3521_v11 = vpop.f32.mrb[9].mxu0 }
 0x1db   : > { %v6563_v13 = vadd.f32 %v3521_v11, %v1588_v44  ;;  %v3710_v15 = vadd.f32 %v6551_v10, %v3709_v24 }
 0x1dc   : > { %3681 = vst [vmem:[%s6520_s18 + $0x48] sm:$0xff] %v6561_v8 }
 0x1dd   : > { %3680 = vst [vmem:[%s6520_s18 + $0x40] sm:$0xff] %v6563_v13  ;;  %v3711_v17 = vadd.f32 %v6563_v13, %v3710_v15  ;;  %v5227_v19 = vpop.f32.mrb[10].mxu0 }
 0x1de   : > { %v6571_v21 = vadd.f32 %v5227_v19, %v4977_v45  ;;  %v3531_v22 = vpop.f32.mrb[11].mxu0 }
 0x1df   : > { %v6573_v37 = vadd.f32 %v3531_v22, %v1598_v46  ;;  %v3712_v33 = vadd.f32 %v6561_v8, %v3711_v17 }
 0x1e0   : > { %3683 = vst [vmem:[%s6520_s18 + $0x58] sm:$0xff] %v6571_v21 }
 0x1e1   : > { %3682 = vst [vmem:[%s6520_s18 + $0x50] sm:$0xff] %v6573_v37  ;;  %v3713_v12 = vadd.f32 %v6573_v37, %v3712_v33  ;;  %v5230_v16 = vpop.f32.mrb[12].mxu0 }
 0x1e2   : > { %v6581_v20 = vadd.f32 %v5230_v16, %v4980_v47  ;;  %v3541_v1 = vpop.f32.mrb[13].mxu0 }
 0x1e3   : > { %v6583_v3 = vadd.f32 %v3541_v1, %v1608_v48  ;;  %v3714_v61 = vadd.f32 %v6571_v21, %v3713_v12 }
 0x1e4   : > { %3685 = vst [vmem:[%s6520_s18 + $0x68] sm:$0xff] %v6581_v20 }
 0x1e5   : > { %3684 = vst [vmem:[%s6520_s18 + $0x60] sm:$0xff] %v6583_v3  ;;  %v3715_v14 = vadd.f32 %v6583_v3, %v3714_v61  ;;  %v5233_v18 = vpop.f32.mrb[14].mxu0 }
 0x1e6   : > { %v6591_v23 = vadd.f32 %v5233_v18, %v4983_v49  ;;  %v3551_v26 = vpop.f32.mrb[15].mxu0 }
 0x1e7   : > { %v6593_v27 = vadd.f32 %v3551_v26, %v1618_v50  ;;  %v3716_v29 = vadd.f32 %v6581_v20, %v3715_v14 }
 0x1e8   : > { %3687 = vst [vmem:[%s6520_s18 + $0x78] sm:$0xff] %v6591_v23 }
 0x1e9   : > { %3686 = vst [vmem:[%s6520_s18 + $0x70] sm:$0xff] %v6593_v27  ;;  %v3717_v30 = vadd.f32 %v6593_v27, %v3716_v29  ;;  %v5036_v31 = vpop.f32.mrb[16].mxu1  ;;  %v5236_v32 = vpop.f32.mrb[16].mxu0 }
 0x1ea   : > { %v6601_v34 = vadd.f32 %v5236_v32, %v5036_v31  ;;  %v2014_v35 = vpop.f32.mrb[17].mxu1  ;;  %v3561_v36 = vpop.f32.mrb[17].mxu0 }
 0x1eb   : > { %v6603_v38 = vadd.f32 %v3561_v36, %v2014_v35  ;;  %v3718_v39 = vadd.f32 %v6591_v23, %v3717_v30 }
 0x1ec   : > { %3689 = vst [vmem:[%s6520_s18 + $0x88] sm:$0xff] %v6601_v34 }
 0x1ed   : > { %3688 = vst [vmem:[%s6520_s18 + $0x80] sm:$0xff] %v6603_v38  ;;  %v3719_v40 = vadd.f32 %v6603_v38, %v3718_v39  ;;  %v5039_v41 = vpop.f32.mrb[18].mxu1  ;;  %v5239_v42 = vpop.f32.mrb[18].mxu0 }
 0x1ee   : > { %v6611_v43 = vadd.f32 %v5239_v42, %v5039_v41  ;;  %v2024_v44 = vpop.f32.mrb[19].mxu1  ;;  %v3571_v45 = vpop.f32.mrb[19].mxu0 }
 0x1ef   : > { %v6613_v46 = vadd.f32 %v3571_v45, %v2024_v44  ;;  %v3720_v47 = vadd.f32 %v6601_v34, %v3719_v40 }
 0x1f0   : > { %3691 = vst [vmem:[%s6520_s18 + $0x98] sm:$0xff] %v6611_v43 }
 0x1f1   : > { %3690 = vst [vmem:[%s6520_s18 + $0x90] sm:$0xff] %v6613_v46  ;;  %v3721_v48 = vadd.f32 %v6613_v46, %v3720_v47  ;;  %v5042_v49 = vpop.f32.mrb[20].mxu1  ;;  %v5242_v50 = vpop.f32.mrb[20].mxu0 }
 0x1f2   : > { %v6621_v51 = vadd.f32 %v5242_v50, %v5042_v49  ;;  %v2034_v53 = vpop.f32.mrb[21].mxu1  ;;  %v3581_v56 = vpop.f32.mrb[21].mxu0 }
 0x1f3   : > { %v6623_v59 = vadd.f32 %v3581_v56, %v2034_v53  ;;  %v3722_v60 = vadd.f32 %v6611_v43, %v3721_v48 }
 0x1f4   : > { %3693 = vst [vmem:[%s6520_s18 + $0xa8] sm:$0xff] %v6621_v51 }
 0x1f5   : > { %3692 = vst [vmem:[%s6520_s18 + $0xa0] sm:$0xff] %v6623_v59  ;;  %v3723_v63 = vadd.f32 %v6623_v59, %v3722_v60  ;;  %v5045_v0 = vpop.f32.mrb[22].mxu1  ;;  %v5245_v4 = vpop.f32.mrb[22].mxu0 }
 0x1f6   : > { %v6631_v6 = vadd.f32 %v5245_v4, %v5045_v0  ;;  %v2044_v7 = vpop.f32.mrb[23].mxu1  ;;  %v3591_v9 = vpop.f32.mrb[23].mxu0 }
 0x1f7   : > { %v6633_v55 = vadd.f32 %v3591_v9, %v2044_v7  ;;  %v3724_v28 = vadd.f32 %v6621_v51, %v3723_v63 }
 0x1f8   : > { %3695 = vst [vmem:[%s6520_s18 + $0xb8] sm:$0xff] %v6631_v6 }
 0x1f9   : > { %3694 = vst [vmem:[%s6520_s18 + $0xb0] sm:$0xff] %v6633_v55  ;;  %v3725_v24 = vadd.f32 %v6633_v55, %v3724_v28  ;;  %v5048_v25 = vpop.f32.mrb[24].mxu1  ;;  %v5248_v11 = vpop.f32.mrb[24].mxu0 }
 0x1fa   : > { %v6641_v15 = vadd.f32 %v5248_v11, %v5048_v25  ;;  %v2054_v17 = vpop.f32.mrb[25].mxu1  ;;  %v3601_v19 = vpop.f32.mrb[25].mxu0 }
 0x1fb   : > { %v5285_v22 = vadd.f32 %v3601_v19, %v2054_v17  ;;  %v3726_v33 = vadd.f32 %v6631_v6, %v3725_v24 }
 0x1fc   : > { %3697 = vst [vmem:[%s6520_s18 + $0xc8] sm:$0xff] %v6641_v15 }
 0x1fd   : > { %3696 = vst [vmem:[%s6520_s18 + $0xc0] sm:$0xff] %v5285_v22  ;;  %v3727_v12 = vadd.f32 %v5285_v22, %v3726_v33  ;;  %v5051_v16 = vpop.f32.mrb[26].mxu1  ;;  %v5251_v1 = vpop.f32.mrb[26].mxu0 }
 0x1fe   : > { %v5286_v61 = vadd.f32 %v5251_v1, %v5051_v16  ;;  %v2064_v14 = vpop.f32.mrb[27].mxu1  ;;  %v3611_v18 = vpop.f32.mrb[27].mxu0 }
 0x1ff   : > { %v5287_v26 = vadd.f32 %v3611_v18, %v2064_v14  ;;  %v3728_v29 = vadd.f32 %v6641_v15, %v3727_v12 }
 0x200   : > { %3699 = vst [vmem:[%s6520_s18 + $0xd8] sm:$0xff] %v5286_v61 }
 0x201   : > { %3698 = vst [vmem:[%s6520_s18 + $0xd0] sm:$0xff] %v5287_v26  ;;  %v3729_v30 = vadd.f32 %v5287_v26, %v3728_v29  ;;  %v5054_v31 = vpop.f32.mrb[28].mxu1  ;;  %v5254_v32 = vpop.f32.mrb[28].mxu0 }
 0x202   : > { %v5288_v35 = vadd.f32 %v5254_v32, %v5054_v31  ;;  %v2074_v36 = vpop.f32.mrb[29].mxu1  ;;  %v3621_v39 = vpop.f32.mrb[29].mxu0 }
 0x203   : > { %v5289_v40 = vadd.f32 %v3621_v39, %v2074_v36  ;;  %v3730_v41 = vadd.f32 %v5286_v61, %v3729_v30 }
 0x204   : > { %3701 = vst [vmem:[%s6520_s18 + $0xe8] sm:$0xff] %v5288_v35 }
 0x205   : > { %3700 = vst [vmem:[%s6520_s18 + $0xe0] sm:$0xff] %v5289_v40  ;;  %v3731_v42 = vadd.f32 %v5289_v40, %v3730_v41  ;;  %v5057_v44 = vpop.f32.mrb[30].mxu1  ;;  %v5257_v45 = vpop.f32.mrb[30].mxu0 }
 0x206   : > { %v5290_v47 = vadd.f32 %v5257_v45, %v5057_v44  ;;  %v2084_v48 = vpop.f32.mrb[31].mxu1  ;;  %v3631_v49 = vpop.f32.mrb[31].mxu0 }
 0x207   : > { %v5291_v50 = vadd.f32 %v3631_v49, %v2084_v48  ;;  %v3732_v53 = vadd.f32 %v5288_v35, %v3731_v42 }
 0x208   : > { %3703 = vst [vmem:[%s6520_s18 + $0xf8] sm:$0xff] %v5290_v47 }
 0x209   : > { %3702 = vst [vmem:[%s6520_s18 + $0xf0] sm:$0xff] %v5291_v50  ;;  %v3733_v56 = vadd.f32 %v5291_v50, %v3732_v53 }
 0x20b   : > { %v3734_v60 = vadd.f32 %v5290_v47, %v3733_v56 }
 0x20d   : > { %v3735_v63 = vrot.slane %v3734_v60, 4 }
 0x20f   : > { %v3736_v0 = vadd.f32 %v3735_v63, %v3734_v60 }
 0x211   : > { %v3737_v4 = vrot.slane %v3736_v0, 2 }
 0x213   : > { %v3738_v7 = vadd.f32 %v3737_v4, %v3736_v0 }
 0x215   : > { %v3739_v9 = vrot.slane %v3738_v7, 1 }
 0x217   : > { %v3740_v28 = vadd.f32 %v3739_v9, %v3738_v7 }
 0x219   : > { %v3741_v24 = vmul.f32 0.00390625, %v3740_v28  ;;  %3774 = vst [vmem:[%s6658_s22] sm:$0x1] %v3740_v28 }
 0x21b   : > { %v3750_v25 = vsub.f32 %v6563_v13, %v3741_v24  ;;  %v3752_v11 = vsub.f32 %v6573_v37, %v3741_v24  ;;  %v3753_v17 = vsub.f32 %v6571_v21, %v3741_v24  ;;  %v3754_v19 = vsub.f32 %v6583_v3, %v3741_v24 }
 0x21c   : > { %v3755_v33 = vsub.f32 %v6581_v20, %v3741_v24  ;;  %v3756_v12 = vsub.f32 %v6593_v27, %v3741_v24  ;;  %v3757_v16 = vsub.f32 %v6591_v23, %v3741_v24  ;;  %v3758_v1 = vsub.f32 %v6603_v38, %v3741_v24 }
 0x21d   : > { %v3759_v14 = vsub.f32 %v6601_v34, %v3741_v24  ;;  %v3760_v18 = vsub.f32 %v6613_v46, %v3741_v24  ;;  %v3761_v13 = vsub.f32 %v6611_v43, %v3741_v24  ;;  %v3762_v37 = vsub.f32 %v6623_v59, %v3741_v24 }
 0x21e   : > { %v3763_v21 = vsub.f32 %v6621_v51, %v3741_v24  ;;  %v3764_v3 = vsub.f32 %v6633_v55, %v3741_v24  ;;  %v3765_v20 = vsub.f32 %v6631_v6, %v3741_v24  ;;  %v6676_v29 = vsub.f32 %v5285_v22, %v3741_v24 }
 0x21f   : > { %v6679_v23 = vsub.f32 %v6641_v15, %v3741_v24  ;;  %v6681_v27 = vsub.f32 %v5287_v26, %v3741_v24  ;;  %v6683_v34 = vsub.f32 %v5286_v61, %v3741_v24  ;;  %v6685_v38 = vsub.f32 %v5289_v40, %v3741_v24 }
 0x220   : > { %v6687_v43 = vsub.f32 %v5288_v35, %v3741_v24  ;;  %v6689_v46 = vsub.f32 %v5291_v50, %v3741_v24  ;;  %v6691_v51 = vsub.f32 %v5290_v47, %v3741_v24  ;;  %v3742_v59 = vsub.f32 %v6524_v54, %v3741_v24 }
 0x221   : > { %v3743_v6 = vsub.f32 %v6522_v52, %v3741_v24  ;;  %v3744_v55 = vsub.f32 %v6534_v62, %v3741_v24  ;;  %v3745_v26 = vsub.f32 %v6530_v58, %v3741_v24  ;;  %v3746_v61 = vsub.f32 %v6543_v5, %v3741_v24 }
 0x222   : > { %v3775_v15 = vmul.f32 %v3742_v59, %v3742_v59  ;;  %v3747_v32 = vsub.f32 %v6541_v2, %v3741_v24  ;;  %v3748_v39 = vsub.f32 %v6553_v57, %v3741_v24  ;;  %v3749_v52 = vsub.f32 %v6551_v10, %v3741_v24 }
 0x223   : > { %v3776_v22 = vmul.f32 %v3743_v6, %v3743_v6  ;;  %v3777_v30 = vmul.f32 %v3744_v55, %v3744_v55  ;;  %v3778_v35 = vmul.f32 %v3745_v26, %v3745_v26  ;;  %v3779_v40 = vmul.f32 %v3746_v61, %v3746_v61 }
 0x224   : > { %v3780_v41 = vmul.f32 %v3747_v32, %v3747_v32  ;;  %v3781_v42 = vmul.f32 %v3748_v39, %v3748_v39  ;;  %v3751_v58 = vsub.f32 %v6561_v8, %v3741_v24  ;;  %v3782_v45 = vmul.f32 %v3749_v52, %v3749_v52 }
 0x225   : > { %v3807_v31 = vadd.f32 %v3776_v22, %v3775_v15  ;;  %v3783_v47 = vmul.f32 %v3750_v25, %v3750_v25  ;;  %v3785_v50 = vmul.f32 %v3752_v11, %v3752_v11  ;;  %v3786_v56 = vmul.f32 %v3753_v17, %v3753_v17 }
 0x226   : > { %v3784_v49 = vmul.f32 %v3751_v58, %v3751_v58  ;;  %v3787_v60 = vmul.f32 %v3754_v19, %v3754_v19  ;;  %v3788_v0 = vmul.f32 %v3755_v33, %v3755_v33  ;;  %v3789_v4 = vmul.f32 %v3756_v12, %v3756_v12 }
 0x227   : > { %v3808_v36 = vadd.f32 %v3807_v31, %v3777_v30  ;;  %v3790_v9 = vmul.f32 %v3757_v16, %v3757_v16  ;;  %v3791_v59 = vmul.f32 %v3758_v1, %v3758_v1  ;;  %v3792_v24 = vmul.f32 %v3759_v14, %v3759_v14 }
 0x228   : > { %v3793_v25 = vmul.f32 %v3760_v18, %v3760_v18  ;;  %v3794_v15 = vmul.f32 %v3761_v13, %v3761_v13  ;;  %v3795_v11 = vmul.f32 %v3762_v37, %v3762_v37  ;;  %v3796_v17 = vmul.f32 %v3763_v21, %v3763_v21 }
 0x229   : > { %v3809_v54 = vadd.f32 %v3808_v36, %v3778_v35  ;;  %v3797_v19 = vmul.f32 %v3764_v3, %v3764_v3  ;;  %v3798_v33 = vmul.f32 %v3765_v20, %v3765_v20  ;;  %v3799_v12 = vmul.f32 %v6676_v29, %v6676_v29 }
 0x22a   : > { %v3800_v1 = vmul.f32 %v6679_v23, %v6679_v23  ;;  %v3801_v18 = vmul.f32 %v6681_v27, %v6681_v27  ;;  %v3802_v37 = vmul.f32 %v6683_v34, %v6683_v34  ;;  %v3803_v3 = vmul.f32 %v6685_v38, %v6685_v38 }
 0x22b   : > { %v3810_v62 = vadd.f32 %v3809_v54, %v3779_v40  ;;  %v3804_v29 = vmul.f32 %v6687_v43, %v6687_v43  ;;  %v3805_v23 = vmul.f32 %v6689_v46, %v6689_v46  ;;  %v3806_v27 = vmul.f32 %v6691_v51, %v6691_v51 }
 0x22d   : > { %v3811_v44 = vadd.f32 %v3810_v62, %v3780_v41 }
 0x22f   : > { %v3812_v5 = vadd.f32 %v3811_v44, %v3781_v42 }
 0x231   : > { %v3813_v48 = vadd.f32 %v3812_v5, %v3782_v45 }
 0x233   : > { %v3814_v2 = vadd.f32 %v3813_v48, %v3783_v47 }
 0x235   : > { %v3815_v53 = vadd.f32 %v3814_v2, %v3784_v49 }
 0x237   : > { %v3816_v57 = vadd.f32 %v3815_v53, %v3785_v50 }
 0x239   : > { %v3817_v63 = vadd.f32 %v3816_v57, %v3786_v56 }
 0x23b   : > { %v3818_v10 = vadd.f32 %v3817_v63, %v3787_v60 }
 0x23d   : > { %v3819_v7 = vadd.f32 %v3818_v10, %v3788_v0 }
 0x23f   : > { %v3820_v28 = vadd.f32 %v3819_v7, %v3789_v4 }
 0x241   : > { %v3821_v8 = vadd.f32 %v3820_v28, %v3790_v9 }
 0x243   : > { %v3822_v6 = vadd.f32 %v3821_v8, %v3791_v59 }
 0x245   : > { %v3823_v55 = vadd.f32 %v3822_v6, %v3792_v24 }
 0x247   : > { %v3824_v22 = vadd.f32 %v3823_v55, %v3793_v25 }
 0x249   : > { %v3825_v26 = vadd.f32 %v3824_v22, %v3794_v15 }
 0x24b   : > { %v3826_v61 = vadd.f32 %v3825_v26, %v3795_v11 }
 0x24d   : > { %v3827_v30 = vadd.f32 %v3826_v61, %v3796_v17 }
 0x24f   : > { %v3828_v31 = vadd.f32 %v3827_v30, %v3797_v19 }
 0x251   : > { %v3829_v16 = vadd.f32 %v3828_v31, %v3798_v33 }
 0x253   : > { %v3830_v14 = vadd.f32 %v3829_v16, %v3799_v12 }
 0x255   : > { %v3831_v13 = vadd.f32 %v3830_v14, %v3800_v1 }
 0x257   : > { %v3832_v21 = vadd.f32 %v3831_v13, %v3801_v18 }
 0x259   : > { %v3833_v20 = vadd.f32 %v3832_v21, %v3802_v37 }
 0x25b   : > { %v3834_v32 = vadd.f32 %v3833_v20, %v3803_v3 }
 0x25d   : > { %v3835_v35 = vadd.f32 %v3834_v32, %v3804_v29 }
 0x25f   : > { %v3836_v36 = vadd.f32 %v3835_v35, %v3805_v23 }
 0x261   : > { %v3837_v39 = vadd.f32 %v3836_v36, %v3806_v27 }
 0x263   : > { %v3838_v34 = vrot.slane %v3837_v39, 4 }
 0x265   : > { %v3839_v40 = vadd.f32 %v3838_v34, %v3837_v39 }
 0x267   : > { %v3840_v54 = vrot.slane %v3839_v40, 2 }
 0x269   : > { %v3841_v52 = vadd.f32 %v3840_v54, %v3839_v40 }
 0x26b   : > { %v3842_v41 = vrot.slane %v3841_v52, 1 }
 0x26d   : > { %v3843_v38 = vadd.f32 %v3842_v41, %v3841_v52 }
 0x26f   : > { %3844 = vst [vmem:[%s6658_s22 + $0x1] sm:$0x1] %v3843_v38 }
 0x270 PF: > { %s14_s14 = sadd.s32 1, %s5563_s14   ;;  %s6841_s12 = smov %s5559_s13 }
 0x271   : > { %p11_p5 = scmp.ge.s32.totalorder %s14_s14, 4   ;;  %s6842_s13 = smov %s6844_s15 }
 0x273   :  { %13 = sbr.rel (!%p11_p5) target bundleno = 2 (0x2), region = 76 }

</bundles_post_ra>
